<compile_context>
chip_gen: v7x
topology: tpu7x:2x2x1
jax: 0.10.0
libtpu: 0.0.40
codegen_flags: <defaults>
</compile_context>

<pallas_src>
import math

import jax
import jax.numpy as jnp
from jax.experimental import pallas as pl
from jax.experimental.pallas import tpu as pltpu

# ---- small DistilBERT-style config (scaled down, same structure) ----
VOCAB = 100        # vocab size
MAX_POS = 64       # max position embeddings
B = 2              # batch
S = 8              # sequence length
D = 128            # hidden dim (lane-dense: multiple of 128)
H = 2              # attention heads
HD = D // H        # head dim (64, same as real DistilBERT)
FFN = 4 * D        # feed-forward inner dim (DistilBERT ratio)
N_LAYERS = 2       # transformer layers
LN_EPS = 1e-12     # BERT/DistilBERT LayerNorm eps
W_DTYPE = jnp.bfloat16   # MXU-input storage dtype for matmul weights


def _layer_norm(x, g, b):
    mu = jnp.mean(x, axis=-1, keepdims=True)
    var = jnp.mean((x - mu) ** 2, axis=-1, keepdims=True)
    return (x - mu) * jax.lax.rsqrt(var + LN_EPS) * g + b


# ---------------------------------------------------------------------------
# Pallas kernel: one transformer layer for one batch slice. grid = (B, L);
# the (1, S, D) activation slice stays resident in the output VMEM block
# across the "arbitrary" layer axis.
# ---------------------------------------------------------------------------
def encoder_layer_kernel(x_in_ref, bias_ref,
                         wqkv_ref, bqkv_ref, wo_ref, bo_ref,
                         g1_ref, be1_ref,
                         w1_ref, bf1_ref, w2_ref, bf2_ref,
                         g2_ref, be2_ref,
                         out_ref):
    layer = pl.program_id(1)

    # Layer 0: seed the resident activation slice from the embedding output.
    @pl.when(layer == 0)
    def _():
        out_ref[...] = x_in_ref[...]

    x = out_ref[0]                                   # (S, D) f32
    xb = x.astype(W_DTYPE)                           # single activation cast per layer

    # ---- fused QKV projection: one full-width (S,128)@(128,384) MXU matmul ----
    # 1/sqrt(HD) scale already folded into the Q slice of wqkv/bqkv at pack time.
    qkv = jnp.dot(xb, wqkv_ref[0],
                  preferred_element_type=jnp.float32) + bqkv_ref[0]      # (S, 3D) f32

    # split into heads: head h = lane block [h*HD, (h+1)*HD) of each D-wide slice
    q = qkv[:, 0 * D:1 * D].reshape(S, H, HD).transpose(1, 0, 2)         # (H, S, HD)
    k = qkv[:, 1 * D:2 * D].reshape(S, H, HD).transpose(1, 0, 2)
    v = qkv[:, 2 * D:3 * D].reshape(S, H, HD).transpose(1, 0, 2)

    # ---- scores + compact key-mask bias (broadcast in-kernel) ----
    s = jnp.einsum("hqf,hkf->hqk", q.astype(W_DTYPE), k.astype(W_DTYPE),
                   preferred_element_type=jnp.float32) + bias_ref[0]     # (H, S, S)
    m = jnp.max(s, axis=-1, keepdims=True)
    p = jnp.exp(s - m)
    w = p * pl.reciprocal(jnp.sum(p, axis=-1, keepdims=True), approx=True)

    ctx = jnp.einsum("hqk,hkf->hqf", w.astype(W_DTYPE), v.astype(W_DTYPE),
                     preferred_element_type=jnp.float32)                 # (H, S, HD)

    # ---- concat heads, single full-width output projection ----
    ctx2 = ctx.transpose(1, 0, 2).reshape(S, D)                          # (S, D)
    attn = jnp.dot(ctx2.astype(W_DTYPE), wo_ref[0],
                   preferred_element_type=jnp.float32) + bo_ref[0]       # (S, D)

    sa = _layer_norm(attn + x, g1_ref[0], be1_ref[0])                    # (S, D)

    # ---- feed-forward ----
    h1 = jnp.dot(sa.astype(W_DTYPE), w1_ref[0],
                 preferred_element_type=jnp.float32) + bf1_ref[0]        # (S, FFN)
    # TODO(synk): DistilBERT uses exact erf-GELU; tanh-approx GELU kept for robust TPU lowering.
    h1 = jax.nn.gelu(h1, approximate=True)
    ffn = jnp.dot(h1.astype(W_DTYPE), w2_ref[0],
                  preferred_element_type=jnp.float32) + bf2_ref[0]       # (S, D)
    out = _layer_norm(ffn + sa, g2_ref[0], be2_ref[0])

    out_ref[0] = out.astype(out_ref.dtype)


def encoder_stack(x, bias, packed):
    """x: (B, S, D) f32; bias: (B, 1, S) f32 additive key mask; packed: 12 stacked params."""
    act_spec = pl.BlockSpec((1, S, D), lambda b, l: (b, 0, 0))
    bias_spec = pl.BlockSpec((1, 1, S), lambda b, l: (b, 0, 0))

    def per_layer_spec(a):
        n = a.ndim - 1
        # One layer's slab per grid step; double-buffered by the Pallas pipeline.
        return pl.BlockSpec((1,) + a.shape[1:], lambda b, l, n=n: (l,) + (0,) * n)

    return pl.pallas_call(
        encoder_layer_kernel,
        out_shape=jax.ShapeDtypeStruct((B, S, D), jnp.float32),
        grid=(B, N_LAYERS),
        in_specs=[act_spec, bias_spec] + [per_layer_spec(p) for p in packed],
        out_specs=act_spec,
        compiler_params=pltpu.CompilerParams(
            dimension_semantics=("parallel", "arbitrary")),  # batch parallel, layer loop resident
    )(x, bias, *packed)


# ---------------------------------------------------------------------------
# Parameter init (deterministic, synthetic — structure matches DistilBERT) and
# packing into kernel-ready stacked tensors (no batch/head duplication).
# ---------------------------------------------------------------------------
def pack_layers(layers):
    scale = 1.0 / math.sqrt(HD)

    def qkv_w(l):
        # columns = [Wq*scale | Wk | Wv], each (D, D) [in, out] -> (D, 3D)
        return jnp.concatenate([l["wq"] * scale, l["wk"], l["wv"]], axis=1)

    def qkv_b(l):
        return jnp.concatenate([l["bq"] * scale, l["bk"], l["bv"]]).reshape(1, 3 * D)

    def stack(fn):
        return jnp.stack([fn(l) for l in layers], axis=0)

    return [
        stack(qkv_w).astype(W_DTYPE),                 # wqkv (L, D, 3D)   bf16
        stack(qkv_b),                                 # bqkv (L, 1, 3D)   f32
        stack(lambda l: l["wo"]).astype(W_DTYPE),     # wo   (L, D, D)    bf16
        stack(lambda l: l["bo"].reshape(1, D)),       # bo   (L, 1, D)
        stack(lambda l: l["ln1_g"].reshape(1, D)),    # sa_layer_norm g
        stack(lambda l: l["ln1_b"].reshape(1, D)),    # sa_layer_norm b
        stack(lambda l: l["w1"]).astype(W_DTYPE),     # ffn.lin1 W (L, D, FFN)
        stack(lambda l: l["b1"].reshape(1, FFN)),     # ffn.lin1 b
        stack(lambda l: l["w2"]).astype(W_DTYPE),     # ffn.lin2 W (L, FFN, D)
        stack(lambda l: l["b2"].reshape(1, D)),       # ffn.lin2 b
        stack(lambda l: l["ln2_g"].reshape(1, D)),    # output_layer_norm g
        stack(lambda l: l["ln2_b"].reshape(1, D)),    # output_layer_norm b
    ]


def init_params(key):
    keys = iter(jax.random.split(key, 2 + 12 * N_LAYERS))

    def w(shape):
        return (0.02 * jax.random.normal(next(keys), shape)).astype(jnp.float32)

    params = {
        "word_emb": w((VOCAB, D)),
        "pos_emb": w((MAX_POS, D)),
        "emb_ln_g": jnp.ones((D,), jnp.float32),
        "emb_ln_b": jnp.zeros((D,), jnp.float32),
    }
    layers = []
    for _ in range(N_LAYERS):
        layers.append(dict(
            wq=w((D, D)), bq=w((D,)),
            wk=w((D, D)), bk=w((D,)),
            wv=w((D, D)), bv=w((D,)),
            wo=w((D, D)), bo=w((D,)),
            ln1_g=jnp.ones((D,), jnp.float32), ln1_b=jnp.zeros((D,), jnp.float32),
            w1=w((D, FFN)), b1=w((FFN,)),
            w2=w((FFN, D)), b2=w((D,)),
            ln2_g=jnp.ones((D,), jnp.float32), ln2_b=jnp.zeros((D,), jnp.float32),
        ))
    params["packed"] = pack_layers(layers)
    return params


# ---------------------------------------------------------------------------
# TextEncoder.forward: embeddings -> fused N-layer transformer -> CLS token
# ---------------------------------------------------------------------------
def text_encoder_forward(params, input_ids, attention_mask=None):
    bsz, seq = input_ids.shape
    if attention_mask is None:
        attention_mask = jnp.ones((bsz, seq), jnp.float32)

    # embeddings (gather + LayerNorm as plain-JAX glue)
    pos = jnp.arange(seq)
    x = params["word_emb"][input_ids] + params["pos_emb"][pos][None, :, :]
    x = _layer_norm(x, params["emb_ln_g"], params["emb_ln_b"]).astype(jnp.float32)

    # compact additive key-mask bias: (B, 1, S); broadcast to (H, S, S) in-kernel
    mask = attention_mask.astype(jnp.float32)                    # 1 = keep, 0 = masked
    bias = ((mask - 1.0) * 1e9).reshape(bsz, 1, seq)             # 0 / -1e9

    hidden = encoder_stack(x, bias, params["packed"])            # (B, S, D)

    # last_hidden_state[:, 0, :]
    return hidden[:, 0, :]


if __name__ == "__main__":
    key = jax.random.PRNGKey(0)
    pkey, ikey = jax.random.split(key)
    params = init_params(pkey)

    input_ids = jax.random.randint(ikey, (B, S), 0, VOCAB, dtype=jnp.int32)
    attention_mask = jnp.ones((B, S), jnp.int32).at[:, S - 2:].set(0)  # pad last 2 tokens

    cls = text_encoder_forward(params, input_ids, attention_mask)
    cls = jax.block_until_ready(cls)
    assert cls.shape == (B, D) and cls.dtype == jnp.float32
    assert bool(jnp.all(jnp.isfinite(cls)))
    print("KERNEL_OK")
</pallas_src>

<mosaic_0001>
module attributes {stable_mosaic.version = 11 : i64} {
  func.func @encoder_layer_kernel(%arg0: i32, %arg1: i32, %arg2: memref<1x8x128xf32, #tpu.memory_space<vmem>>, %arg3: memref<1x1x8xf32, #tpu.memory_space<vmem>>, %arg4: memref<1x128x384xbf16, #tpu.memory_space<vmem>>, %arg5: memref<1x1x384xf32, #tpu.memory_space<vmem>>, %arg6: memref<1x128x128xbf16, #tpu.memory_space<vmem>>, %arg7: memref<1x1x128xf32, #tpu.memory_space<vmem>>, %arg8: memref<1x1x128xf32, #tpu.memory_space<vmem>>, %arg9: memref<1x1x128xf32, #tpu.memory_space<vmem>>, %arg10: memref<1x128x512xbf16, #tpu.memory_space<vmem>>, %arg11: memref<1x1x512xf32, #tpu.memory_space<vmem>>, %arg12: memref<1x512x128xbf16, #tpu.memory_space<vmem>>, %arg13: memref<1x1x128xf32, #tpu.memory_space<vmem>>, %arg14: memref<1x1x128xf32, #tpu.memory_space<vmem>>, %arg15: memref<1x1x128xf32, #tpu.memory_space<vmem>>, %arg16: memref<1x8x128xf32, #tpu.memory_space<vmem>>) attributes {dimension_semantics = [#tpu.dimension_semantics<parallel>, #tpu.dimension_semantics<arbitrary>], iteration_bounds = array<i64: 2, 2>, scalar_prefetch = 0 : i64, scratch_operands = 0 : i64, tpu.core_type = #tpu.core_type<tc>, window_params = [{transform_indices = @transform_0, window_bounds = array<i64: 1, 8, 128>}, {transform_indices = @transform_1, window_bounds = array<i64: 1, 1, 8>}, {transform_indices = @transform_2, window_bounds = array<i64: 1, 128, 384>}, {transform_indices = @transform_3, window_bounds = array<i64: 1, 1, 384>}, {transform_indices = @transform_4, window_bounds = array<i64: 1, 128, 128>}, {transform_indices = @transform_5, window_bounds = array<i64: 1, 1, 128>}, {transform_indices = @transform_6, window_bounds = array<i64: 1, 1, 128>}, {transform_indices = @transform_7, window_bounds = array<i64: 1, 1, 128>}, {transform_indices = @transform_8, window_bounds = array<i64: 1, 128, 512>}, {transform_indices = @transform_9, window_bounds = array<i64: 1, 1, 512>}, {transform_indices = @transform_10, window_bounds = array<i64: 1, 512, 128>}, {transform_indices = @transform_11, window_bounds = array<i64: 1, 1, 128>}, {transform_indices = @transform_12, window_bounds = array<i64: 1, 1, 128>}, {transform_indices = @transform_13, window_bounds = array<i64: 1, 1, 128>}, {transform_indices = @transform_14, window_bounds = array<i64: 1, 8, 128>}]} {
    %c0_i32 = arith.constant 0 : i32
    %0 = arith.cmpi eq, %arg1, %c0_i32 : i32
    %1 = arith.extui %0 : i1 to i32
    %c0_i32_0 = arith.constant 0 : i32
    %2 = arith.cmpi ne, %1, %c0_i32_0 : i32
    scf.if %2 {
      %c0_66 = arith.constant 0 : index
      %c0_67 = arith.constant 0 : index
      %c0_68 = arith.constant 0 : index
      %139 = vector.load %arg2[%c0_66, %c0_67, %c0_68] : memref<1x8x128xf32, #tpu.memory_space<vmem>>, vector<1x8x128xf32>
      %c0_69 = arith.constant 0 : index
      %c0_70 = arith.constant 0 : index
      %c0_71 = arith.constant 0 : index
      %140 = vector.load %arg16[%c0_69, %c0_70, %c0_71] : memref<1x8x128xf32, #tpu.memory_space<vmem>>, vector<1x8x128xf32>
      tpu.vector_store %arg16[%c0_69, %c0_70, %c0_71], %139 {strides = array<i32>} : memref<1x8x128xf32, #tpu.memory_space<vmem>>, vector<1x8x128xf32>,
    } else {
    }
    %c0 = arith.constant 0 : index
    %c0_1 = arith.constant 0 : index
    %c0_2 = arith.constant 0 : index
    %3 = vector.load %arg16[%c0, %c0_1, %c0_2] : memref<1x8x128xf32, #tpu.memory_space<vmem>>, vector<1x8x128xf32>
    %4 = vector.shape_cast %3 : vector<1x8x128xf32> to vector<8x128xf32>
    %5 = arith.truncf %4 : vector<8x128xf32> to vector<8x128xbf16>
    %c0_3 = arith.constant 0 : index
    %c0_4 = arith.constant 0 : index
    %c0_5 = arith.constant 0 : index
    %6 = vector.load %arg4[%c0_3, %c0_4, %c0_5] : memref<1x128x384xbf16, #tpu.memory_space<vmem>>, vector<1x128x384xbf16>
    %7 = vector.shape_cast %6 : vector<1x128x384xbf16> to vector<128x384xbf16>
    %cst = arith.constant dense<0.000000e+00> : vector<8x384xf32>
    %8 = tpu.matmul %5, %7, %cst {dimension_numbers = #tpu.dot_dimension_numbers<[1], [0], [0], [1], [0, 0, 1, 1], [], []>} : vector<8x128xbf16>, vector<128x384xbf16>, vector<8x384xf32> -> vector<8x384xf32>
    %c0_6 = arith.constant 0 : index
    %c0_7 = arith.constant 0 : index
    %c0_8 = arith.constant 0 : index
    %9 = vector.load %arg5[%c0_6, %c0_7, %c0_8] : memref<1x1x384xf32, #tpu.memory_space<vmem>>, vector<1x1x384xf32>
    %10 = vector.shape_cast %9 : vector<1x1x384xf32> to vector<1x384xf32>
    %11 = vector.broadcast %10 : vector<1x384xf32> to vector<8x384xf32>
    %12 = arith.addf %8, %11 : vector<8x384xf32>
    %13 = vector.extract_strided_slice %12 {offsets = [0, 0], sizes = [8, 128], strides = [1, 1]} : vector<8x384xf32> to vector<8x128xf32>
    %14 = vector.shape_cast %13 : vector<8x128xf32> to vector<8x2x64xf32>
    %15 = tpu.transpose %14, [1, 0, 2] : vector<8x2x64xf32> -> vector<2x8x64xf32>
    %16 = vector.extract_strided_slice %12 {offsets = [0, 128], sizes = [8, 128], strides = [1, 1]} : vector<8x384xf32> to vector<8x128xf32>
    %17 = vector.shape_cast %16 : vector<8x128xf32> to vector<8x2x64xf32>
    %18 = tpu.transpose %17, [1, 0, 2] : vector<8x2x64xf32> -> vector<2x8x64xf32>
    %19 = vector.extract_strided_slice %12 {offsets = [0, 256], sizes = [8, 128], strides = [1, 1]} : vector<8x384xf32> to vector<8x128xf32>
    %20 = vector.shape_cast %19 : vector<8x128xf32> to vector<8x2x64xf32>
    %21 = tpu.transpose %20, [1, 0, 2] : vector<8x2x64xf32> -> vector<2x8x64xf32>
    %22 = arith.truncf %15 : vector<2x8x64xf32> to vector<2x8x64xbf16>
    %23 = arith.truncf %18 : vector<2x8x64xf32> to vector<2x8x64xbf16>
    "tpu.trace_start"() <{level = 10 : i32, message = "hqf,hkf->hqk"}> : () -> ()
    %cst_9 = arith.constant dense<0.000000e+00> : vector<2x8x8xf32>
    %24 = tpu.matmul %22, %23, %cst_9 {dimension_numbers = #tpu.dot_dimension_numbers<[2], [2], [1], [1], [0, 0, 0, 1, 1, 1], [0], [0]>} : vector<2x8x64xbf16>, vector<2x8x64xbf16>, vector<2x8x8xf32> -> vector<2x8x8xf32>
    "tpu.trace_stop"() : () -> ()
    %c0_10 = arith.constant 0 : index
    %c0_11 = arith.constant 0 : index
    %c0_12 = arith.constant 0 : index
    %25 = vector.load %arg3[%c0_10, %c0_11, %c0_12] : memref<1x1x8xf32, #tpu.memory_space<vmem>>, vector<1x1x8xf32>
    %26 = vector.shape_cast %25 : vector<1x1x8xf32> to vector<1x8xf32>
    %27 = vector.shape_cast %26 : vector<1x8xf32> to vector<1x1x8xf32>
    %28 = vector.broadcast %27 : vector<1x1x8xf32> to vector<2x8x8xf32>
    %29 = arith.addf %24, %28 : vector<2x8x8xf32>
    %cst_13 = arith.constant dense<0xFF800000> : vector<2x8xf32>
    %30 = vector.multi_reduction <maximumf>, %29, %cst_13 [2] : vector<2x8x8xf32> to vector<2x8xf32>
    %31 = vector.shape_cast %30 : vector<2x8xf32> to vector<2x8x1xf32>
    %32 = vector.broadcast %31 : vector<2x8x1xf32> to vector<2x8x8xf32>
    %33 = arith.subf %29, %32 : vector<2x8x8xf32>
    %34 = math.exp %33 : vector<2x8x8xf32>
    %cst_14 = arith.constant dense<0.000000e+00> : vector<2x8xf32>
    %35 = vector.multi_reduction <add>, %34, %cst_14 [2] : vector<2x8x8xf32> to vector<2x8xf32>
    %36 = vector.shape_cast %35 : vector<2x8xf32> to vector<2x8x1xf32>
    %37 = tpu.reciprocal %36 {approx = true} : vector<2x8x1xf32> -> vector<2x8x1xf32>
    %38 = vector.broadcast %37 : vector<2x8x1xf32> to vector<2x8x8xf32>
    %39 = arith.mulf %34, %38 : vector<2x8x8xf32>
    %40 = arith.truncf %39 : vector<2x8x8xf32> to vector<2x8x8xbf16>
    %41 = arith.truncf %21 : vector<2x8x64xf32> to vector<2x8x64xbf16>
    "tpu.trace_start"() <{level = 10 : i32, message = "hqk,hkf->hqf"}> : () -> ()
    %cst_15 = arith.constant dense<0.000000e+00> : vector<2x8x64xf32>
    %42 = tpu.matmul %40, %41, %cst_15 {dimension_numbers = #tpu.dot_dimension_numbers<[2], [1], [1], [2], [0, 0, 0, 1, 1, 2], [0], [0]>} : vector<2x8x8xbf16>, vector<2x8x64xbf16>, vector<2x8x64xf32> -> vector<2x8x64xf32>
    "tpu.trace_stop"() : () -> ()
    %43 = tpu.transpose %42, [1, 0, 2] : vector<2x8x64xf32> -> vector<8x2x64xf32>
    %44 = vector.shape_cast %43 : vector<8x2x64xf32> to vector<8x128xf32>
    %45 = arith.truncf %44 : vector<8x128xf32> to vector<8x128xbf16>
    %c0_16 = arith.constant 0 : index
    %c0_17 = arith.constant 0 : index
    %c0_18 = arith.constant 0 : index
    %46 = vector.load %arg6[%c0_16, %c0_17, %c0_18] : memref<1x128x128xbf16, #tpu.memory_space<vmem>>, vector<1x128x128xbf16>
    %47 = vector.shape_cast %46 : vector<1x128x128xbf16> to vector<128x128xbf16>
    %cst_19 = arith.constant dense<0.000000e+00> : vector<8x128xf32>
    %48 = tpu.matmul %45, %47, %cst_19 {dimension_numbers = #tpu.dot_dimension_numbers<[1], [0], [0], [1], [0, 0, 1, 1], [], []>} : vector<8x128xbf16>, vector<128x128xbf16>, vector<8x128xf32> -> vector<8x128xf32>
    %c0_20 = arith.constant 0 : index
    %c0_21 = arith.constant 0 : index
    %c0_22 = arith.constant 0 : index
    %49 = vector.load %arg7[%c0_20, %c0_21, %c0_22] : memref<1x1x128xf32, #tpu.memory_space<vmem>>, vector<1x1x128xf32>
    %50 = vector.shape_cast %49 : vector<1x1x128xf32> to vector<1x128xf32>
    %51 = vector.broadcast %50 : vector<1x128xf32> to vector<8x128xf32>
    %52 = arith.addf %48, %51 : vector<8x128xf32>
    %53 = arith.addf %52, %4 : vector<8x128xf32>
    %c0_23 = arith.constant 0 : index
    %c0_24 = arith.constant 0 : index
    %c0_25 = arith.constant 0 : index
    %54 = vector.load %arg8[%c0_23, %c0_24, %c0_25] : memref<1x1x128xf32, #tpu.memory_space<vmem>>, vector<1x1x128xf32>
    %55 = vector.shape_cast %54 : vector<1x1x128xf32> to vector<1x128xf32>
    %c0_26 = arith.constant 0 : index
    %c0_27 = arith.constant 0 : index
    %c0_28 = arith.constant 0 : index
    %56 = vector.load %arg9[%c0_26, %c0_27, %c0_28] : memref<1x1x128xf32, #tpu.memory_space<vmem>>, vector<1x1x128xf32>
    %57 = vector.shape_cast %56 : vector<1x1x128xf32> to vector<1x128xf32>
    %cst_29 = arith.constant dense<0.000000e+00> : vector<8xf32>
    %58 = vector.multi_reduction <add>, %53, %cst_29 [1] : vector<8x128xf32> to vector<8xf32>
    %59 = vector.shape_cast %58 : vector<8xf32> to vector<8x1xf32>
    %cst_30 = arith.constant 1.280000e+02 : f32
    %60 = vector.broadcast %cst_30 : f32 to vector<8x1xf32>
    %61 = arith.divf %59, %60 : vector<8x1xf32>
    %62 = vector.broadcast %61 : vector<8x1xf32> to vector<8x128xf32>
    %63 = arith.subf %53, %62 : vector<8x128xf32>
    %64 = arith.mulf %63, %63 : vector<8x128xf32>
    %cst_31 = arith.constant dense<0.000000e+00> : vector<8xf32>
    %65 = vector.multi_reduction <add>, %64, %cst_31 [1] : vector<8x128xf32> to vector<8xf32>
    %66 = vector.shape_cast %65 : vector<8xf32> to vector<8x1xf32>
    %cst_32 = arith.constant 1.280000e+02 : f32
    %67 = vector.broadcast %cst_32 : f32 to vector<8x1xf32>
    %68 = arith.divf %66, %67 : vector<8x1xf32>
    %69 = vector.broadcast %61 : vector<8x1xf32> to vector<8x128xf32>
    %70 = arith.subf %53, %69 : vector<8x128xf32>
    %cst_33 = arith.constant 9.99999996E-13 : f32
    %71 = vector.broadcast %cst_33 : f32 to vector<8x1xf32>
    %72 = arith.addf %68, %71 : vector<8x1xf32>
    %73 = math.rsqrt %72 : vector<8x1xf32>
    %74 = vector.broadcast %73 : vector<8x1xf32> to vector<8x128xf32>
    %75 = arith.mulf %70, %74 : vector<8x128xf32>
    %76 = vector.broadcast %55 : vector<1x128xf32> to vector<8x128xf32>
    %77 = arith.mulf %75, %76 : vector<8x128xf32>
    %78 = vector.broadcast %57 : vector<1x128xf32> to vector<8x128xf32>
    %79 = arith.addf %77, %78 : vector<8x128xf32>
    %80 = arith.truncf %79 : vector<8x128xf32> to vector<8x128xbf16>
    %c0_34 = arith.constant 0 : index
    %c0_35 = arith.constant 0 : index
    %c0_36 = arith.constant 0 : index
    %81 = vector.load %arg10[%c0_34, %c0_35, %c0_36] : memref<1x128x512xbf16, #tpu.memory_space<vmem>>, vector<1x128x512xbf16>
    %82 = vector.shape_cast %81 : vector<1x128x512xbf16> to vector<128x512xbf16>
    %cst_37 = arith.constant dense<0.000000e+00> : vector<8x512xf32>
    %83 = tpu.matmul %80, %82, %cst_37 {dimension_numbers = #tpu.dot_dimension_numbers<[1], [0], [0], [1], [0, 0, 1, 1], [], []>} : vector<8x128xbf16>, vector<128x512xbf16>, vector<8x512xf32> -> vector<8x512xf32>
    %c0_38 = arith.constant 0 : index
    %c0_39 = arith.constant 0 : index
    %c0_40 = arith.constant 0 : index
    %84 = vector.load %arg11[%c0_38, %c0_39, %c0_40] : memref<1x1x512xf32, #tpu.memory_space<vmem>>, vector<1x1x512xf32>
    %85 = vector.shape_cast %84 : vector<1x1x512xf32> to vector<1x512xf32>
    %86 = vector.broadcast %85 : vector<1x512xf32> to vector<8x512xf32>
    %87 = arith.addf %83, %86 : vector<8x512xf32>
    %88 = arith.mulf %87, %87 : vector<8x512xf32>
    %89 = arith.mulf %87, %88 : vector<8x512xf32>
    %cst_41 = arith.constant 4.471500e-02 : f32
    %90 = vector.broadcast %cst_41 : f32 to vector<8x512xf32>
    %91 = arith.mulf %90, %89 : vector<8x512xf32>
    %92 = arith.addf %87, %91 : vector<8x512xf32>
    %cst_42 = arith.constant 0.797884583 : f32
    %93 = vector.broadcast %cst_42 : f32 to vector<8x512xf32>
    %94 = arith.mulf %93, %92 : vector<8x512xf32>
    %95 = math.tanh %94 : vector<8x512xf32>
    %cst_43 = arith.constant 1.000000e+00 : f32
    %96 = vector.broadcast %cst_43 : f32 to vector<8x512xf32>
    %97 = arith.addf %96, %95 : vector<8x512xf32>
    %cst_44 = arith.constant 5.000000e-01 : f32
    %98 = vector.broadcast %cst_44 : f32 to vector<8x512xf32>
    %99 = arith.mulf %98, %97 : vector<8x512xf32>
    %100 = arith.mulf %87, %99 : vector<8x512xf32>
    %101 = arith.truncf %100 : vector<8x512xf32> to vector<8x512xbf16>
    %c0_45 = arith.constant 0 : index
    %c0_46 = arith.constant 0 : index
    %c0_47 = arith.constant 0 : index
    %102 = vector.load %arg12[%c0_45, %c0_46, %c0_47] : memref<1x512x128xbf16, #tpu.memory_space<vmem>>, vector<1x512x128xbf16>
    %103 = vector.shape_cast %102 : vector<1x512x128xbf16> to vector<512x128xbf16>
    %cst_48 = arith.constant dense<0.000000e+00> : vector<8x128xf32>
    %104 = tpu.matmul %101, %103, %cst_48 {dimension_numbers = #tpu.dot_dimension_numbers<[1], [0], [0], [1], [0, 0, 1, 1], [], []>} : vector<8x512xbf16>, vector<512x128xbf16>, vector<8x128xf32> -> vector<8x128xf32>
    %c0_49 = arith.constant 0 : index
    %c0_50 = arith.constant 0 : index
    %c0_51 = arith.constant 0 : index
    %105 = vector.load %arg13[%c0_49, %c0_50, %c0_51] : memref<1x1x128xf32, #tpu.memory_space<vmem>>, vector<1x1x128xf32>
    %106 = vector.shape_cast %105 : vector<1x1x128xf32> to vector<1x128xf32>
    %107 = vector.broadcast %106 : vector<1x128xf32> to vector<8x128xf32>
    %108 = arith.addf %104, %107 : vector<8x128xf32>
    %109 = arith.addf %108, %79 : vector<8x128xf32>
    %c0_52 = arith.constant 0 : index
    %c0_53 = arith.constant 0 : index
    %c0_54 = arith.constant 0 : index
    %110 = vector.load %arg14[%c0_52, %c0_53, %c0_54] : memref<1x1x128xf32, #tpu.memory_space<vmem>>, vector<1x1x128xf32>
    %111 = vector.shape_cast %110 : vector<1x1x128xf32> to vector<1x128xf32>
    %c0_55 = arith.constant 0 : index
    %c0_56 = arith.constant 0 : index
    %c0_57 = arith.constant 0 : index
    %112 = vector.load %arg15[%c0_55, %c0_56, %c0_57] : memref<1x1x128xf32, #tpu.memory_space<vmem>>, vector<1x1x128xf32>
    %113 = vector.shape_cast %112 : vector<1x1x128xf32> to vector<1x128xf32>
    %cst_58 = arith.constant dense<0.000000e+00> : vector<8xf32>
    %114 = vector.multi_reduction <add>, %109, %cst_58 [1] : vector<8x128xf32> to vector<8xf32>
    %115 = vector.shape_cast %114 : vector<8xf32> to vector<8x1xf32>
    %cst_59 = arith.constant 1.280000e+02 : f32
    %116 = vector.broadcast %cst_59 : f32 to vector<8x1xf32>
    %117 = arith.divf %115, %116 : vector<8x1xf32>
    %118 = vector.broadcast %117 : vector<8x1xf32> to vector<8x128xf32>
    %119 = arith.subf %109, %118 : vector<8x128xf32>
    %120 = arith.mulf %119, %119 : vector<8x128xf32>
    %cst_60 = arith.constant dense<0.000000e+00> : vector<8xf32>
    %121 = vector.multi_reduction <add>, %120, %cst_60 [1] : vector<8x128xf32> to vector<8xf32>
    %122 = vector.shape_cast %121 : vector<8xf32> to vector<8x1xf32>
    %cst_61 = arith.constant 1.280000e+02 : f32
    %123 = vector.broadcast %cst_61 : f32 to vector<8x1xf32>
    %124 = arith.divf %122, %123 : vector<8x1xf32>
    %125 = vector.broadcast %117 : vector<8x1xf32> to vector<8x128xf32>
    %126 = arith.subf %109, %125 : vector<8x128xf32>
    %cst_62 = arith.constant 9.99999996E-13 : f32
    %127 = vector.broadcast %cst_62 : f32 to vector<8x1xf32>
    %128 = arith.addf %124, %127 : vector<8x1xf32>
    %129 = math.rsqrt %128 : vector<8x1xf32>
    %130 = vector.broadcast %129 : vector<8x1xf32> to vector<8x128xf32>
    %131 = arith.mulf %126, %130 : vector<8x128xf32>
    %132 = vector.broadcast %111 : vector<1x128xf32> to vector<8x128xf32>
    %133 = arith.mulf %131, %132 : vector<8x128xf32>
    %134 = vector.broadcast %113 : vector<1x128xf32> to vector<8x128xf32>
    %135 = arith.addf %133, %134 : vector<8x128xf32>
    %c0_63 = arith.constant 0 : index
    %c0_64 = arith.constant 0 : index
    %c0_65 = arith.constant 0 : index
    %136 = vector.load %arg16[%c0_63, %c0_64, %c0_65] : memref<1x8x128xf32, #tpu.memory_space<vmem>>, vector<1x8x128xf32>
    %137 = vector.shape_cast %136 : vector<1x8x128xf32> to vector<8x128xf32>
    %138 = vector.shape_cast %135 : vector<8x128xf32> to vector<1x8x128xf32>
    tpu.vector_store %arg16[%c0_63, %c0_64, %c0_65], %138 {strides = array<i32>} : memref<1x8x128xf32, #tpu.memory_space<vmem>>, vector<1x8x128xf32>,
    return
  }
  func.func @transform_0(%arg0: i32, %arg1: i32) -> (i32, i32, i32) {
    %c0_i32 = arith.constant 0 : i32
    %c0_i32_0 = arith.constant 0 : i32
    %c0_i32_1 = arith.constant 0 : i32
    return %arg0, %c0_i32, %c0_i32_0 : i32, i32, i32
  }
  func.func @transform_1(%arg0: i32, %arg1: i32) -> (i32, i32, i32) {
    %c0_i32 = arith.constant 0 : i32
    %c0_i32_0 = arith.constant 0 : i32
    %c0_i32_1 = arith.constant 0 : i32
    return %arg0, %c0_i32, %c0_i32_0 : i32, i32, i32
  }
  func.func @transform_2(%arg0: i32, %arg1: i32) -> (i32, i32, i32) {
    %c0_i32 = arith.constant 0 : i32
    %c0_i32_0 = arith.constant 0 : i32
    %c0_i32_1 = arith.constant 0 : i32
    return %arg1, %c0_i32, %c0_i32_0 : i32, i32, i32
  }
  func.func @transform_3(%arg0: i32, %arg1: i32) -> (i32, i32, i32) {
    %c0_i32 = arith.constant 0 : i32
    %c0_i32_0 = arith.constant 0 : i32
    %c0_i32_1 = arith.constant 0 : i32
    return %arg1, %c0_i32, %c0_i32_0 : i32, i32, i32
  }
  func.func @transform_4(%arg0: i32, %arg1: i32) -> (i32, i32, i32) {
    %c0_i32 = arith.constant 0 : i32
    %c0_i32_0 = arith.constant 0 : i32
    %c0_i32_1 = arith.constant 0 : i32
    return %arg1, %c0_i32, %c0_i32_0 : i32, i32, i32
  }
  func.func @transform_5(%arg0: i32, %arg1: i32) -> (i32, i32, i32) {
    %c0_i32 = arith.constant 0 : i32
    %c0_i32_0 = arith.constant 0 : i32
    %c0_i32_1 = arith.constant 0 : i32
    return %arg1, %c0_i32, %c0_i32_0 : i32, i32, i32
  }
  func.func @transform_6(%arg0: i32, %arg1: i32) -> (i32, i32, i32) {
    %c0_i32 = arith.constant 0 : i32
    %c0_i32_0 = arith.constant 0 : i32
    %c0_i32_1 = arith.constant 0 : i32
    return %arg1, %c0_i32, %c0_i32_0 : i32, i32, i32
  }
  func.func @transform_7(%arg0: i32, %arg1: i32) -> (i32, i32, i32) {
    %c0_i32 = arith.constant 0 : i32
    %c0_i32_0 = arith.constant 0 : i32
    %c0_i32_1 = arith.constant 0 : i32
    return %arg1, %c0_i32, %c0_i32_0 : i32, i32, i32
  }
  func.func @transform_8(%arg0: i32, %arg1: i32) -> (i32, i32, i32) {
    %c0_i32 = arith.constant 0 : i32
    %c0_i32_0 = arith.constant 0 : i32
    %c0_i32_1 = arith.constant 0 : i32
    return %arg1, %c0_i32, %c0_i32_0 : i32, i32, i32
  }
  func.func @transform_9(%arg0: i32, %arg1: i32) -> (i32, i32, i32) {
    %c0_i32 = arith.constant 0 : i32
    %c0_i32_0 = arith.constant 0 : i32
    %c0_i32_1 = arith.constant 0 : i32
    return %arg1, %c0_i32, %c0_i32_0 : i32, i32, i32
  }
  func.func @transform_10(%arg0: i32, %arg1: i32) -> (i32, i32, i32) {
    %c0_i32 = arith.constant 0 : i32
    %c0_i32_0 = arith.constant 0 : i32
    %c0_i32_1 = arith.constant 0 : i32
    return %arg1, %c0_i32, %c0_i32_0 : i32, i32, i32
  }
  func.func @transform_11(%arg0: i32, %arg1: i32) -> (i32, i32, i32) {
    %c0_i32 = arith.constant 0 : i32
    %c0_i32_0 = arith.constant 0 : i32
    %c0_i32_1 = arith.constant 0 : i32
    return %arg1, %c0_i32, %c0_i32_0 : i32, i32, i32
  }
  func.func @transform_12(%arg0: i32, %arg1: i32) -> (i32, i32, i32) {
    %c0_i32 = arith.constant 0 : i32
    %c0_i32_0 = arith.constant 0 : i32
    %c0_i32_1 = arith.constant 0 : i32
    return %arg1, %c0_i32, %c0_i32_0 : i32, i32, i32
  }
  func.func @transform_13(%arg0: i32, %arg1: i32) -> (i32, i32, i32) {
    %c0_i32 = arith.constant 0 : i32
    %c0_i32_0 = arith.constant 0 : i32
    %c0_i32_1 = arith.constant 0 : i32
    return %arg1, %c0_i32, %c0_i32_0 : i32, i32, i32
  }
  func.func @transform_14(%arg0: i32, %arg1: i32) -> (i32, i32, i32) {
    %c0_i32 = arith.constant 0 : i32
    %c0_i32_0 = arith.constant 0 : i32
    %c0_i32_1 = arith.constant 0 : i32
    return %arg0, %c0_i32, %c0_i32_0 : i32, i32, i32
  }
}

</mosaic_0001>

<bundles_post_ra>
// kernel: tpu_custom_call.1
= control target key start
LH: loop header
LB: loop body
LE: loop exit
PB: predicated region body
PF: predicated region fallthrough
CT: control target
= control target key end

     0   :  { %s4709_s0 = inlined_call_operand.hbm [shape: f32[2,8,128], index: 0, kind: input, shape index: {}]   ;;  %s4710_s1 = inlined_call_operand.hbm [shape: f32[2,1,8], index: 1, kind: input, shape index: {}]   ;;  %s4711_s2 = inlined_call_operand.hbm [shape: bf16[2,128,384], index: 2, kind: input, shape index: {}]   ;;  %s4712_s3 = inlined_call_operand.vmem [shape: f32[2,1,384], index: 3, kind: input, shape index: {}]   ;;  %s4713_s4 = inlined_call_operand.hbm [shape: bf16[2,128,128], index: 4, kind: input, shape index: {}]   ;;  %s4714_s5 = inlined_call_operand.vmem [shape: f32[2,1,128], index: 5, kind: input, shape index: {}]   ;;  %s4715_s6 = inlined_call_operand.vmem [shape: f32[2,1,128], index: 6, kind: input, shape index: {}]   ;;  %s4716_s7 = inlined_call_operand.vmem [shape: f32[2,1,128], index: 7, kind: input, shape index: {}]   ;;  %s4717_s8 = inlined_call_operand.hbm [shape: bf16[2,128,512], index: 8, kind: input, shape index: {}]   ;;  %s4718_s9 = inlined_call_operand.vmem [shape: f32[2,1,512], index: 9, kind: input, shape index: {}]   ;;  %s4719_s10 = inlined_call_operand.hbm [shape: bf16[2,512,128], index: 10, kind: input, shape index: {}]   ;;  %s4720_s11 = inlined_call_operand.vmem [shape: f32[2,1,128], index: 11, kind: input, shape index: {}]   ;;  %s4721_s12 = inlined_call_operand.vmem [shape: f32[2,1,128], index: 12, kind: input, shape index: {}]   ;;  %s4722_s13 = inlined_call_operand.vmem [shape: f32[2,1,128], index: 13, kind: input, shape index: {}]   ;;  %s4723_s14 = inlined_call_operand.hbm [shape: f32[2,8,128], index: 14, kind: output, shape index: {}]  }
   0x1   :  { %4754 = sst [smem:[#allocation37_spill]] %s4709_s0 }
   0x2   :  { %4755 = sst [smem:[#allocation38_spill]] %s4710_s1 }
   0x3   :  { %4756 = sst [smem:[#allocation39_spill]] %s4711_s2 }
   0x4   :  { %4757 = sst [smem:[#allocation40_spill]] %s4712_s3 }
   0x5   :  { %4758 = sst [smem:[#allocation41_spill]] %s4713_s4 }
   0x6   :  { %4759 = sst [smem:[#allocation42_spill]] %s4714_s5 }
   0x7   :  { %4760 = sst [smem:[#allocation43_spill]] %s4715_s6 }
   0x8   :  { %4761 = sst [smem:[#allocation44_spill]] %s4716_s7 }
   0x9   :  { %4762 = sst [smem:[#allocation45_spill]] %s4717_s8 }
   0xa   :  { %4763 = sst [smem:[#allocation46_spill]] %s4718_s9 }
   0xb   :  { %4764 = sst [smem:[#allocation47_spill]] %s4719_s10 }
   0xc   :  { %4765 = sst [smem:[#allocation48_spill]] %s4720_s11 }
   0xd   :  { %4766 = sst [smem:[#allocation49_spill]] %s4721_s12 }
   0xe   :  { %4767 = sst [smem:[#allocation50_spill]] %s4722_s13 }
   0xf   :  { %4768 = sst [smem:[#allocation51_spill]] %s4723_s14 }
  0x10   :  { %19 = vsyncpa [#allocation3], 0 }
  0x11   :  { %21 = vsyncpa [#allocation3 + $0x1], 0 }
  0x12   :  { %22 = vsyncpa [#allocation6], 0 }
  0x13   :  { %24 = vsyncpa [#allocation6 + $0x1], 0 }
  0x14   :  { %25 = vsyncpa [#allocation9], 0 }
  0x15   :  { %27 = vsyncpa [#allocation9 + $0x1], 0 }
  0x16   :  { %28 = vsyncpa [#allocation12], 0 }
  0x17   :  { %30 = vsyncpa [#allocation12 + $0x1], 0 }
  0x18   :  { %31 = vsyncpa [#allocation4], 0 }
  0x19   :  { %33 = vsyncpa [#allocation4 + $0x1], 0  ;;  %s3880_s29 = smov 0   ;;  %s3882_s30 = smov 0  }
  0x1a   :  { %s3884_s15 = smov 0   ;;  %s3886_s16 = smov 0  }
  0x1b   :  { %s3888_s17 = smov 0   ;;  %s3890_s18 = smov 0  }
  0x1c   :  { %s3892_s19 = smov 0   ;;  %s3894_s20 = smov 0  }
  0x1d   :  { %s3896_s21 = smov 0   ;;  %s3898_s22 = smov 0  }
  0x1e   :  { %s3900_s23 = smov 0  }
  0x1f LB: > { %4769 = sst [smem:[#allocation20_spill]] %s3748_s30  ;;  %s3936_s24 = sadd.s32 4294967295, %s3784_s23   ;;  %s3784_s23 = sphi %s3900_s23, %s39_s23   ;;  %s3780_s22 = sphi %s3898_s22, %s4850_s22   ;;  %s3776_s21 = sphi %s3896_s21, %s4849_s21   ;;  %s3772_s20 = sphi %s3894_s20, %s4848_s20   ;;  %s3768_s19 = sphi %s3892_s19, %s4847_s19   ;;  %s3764_s18 = sphi %s3890_s18, %s4853_s18   ;;  %s3760_s17 = sphi %s3888_s17, %s4852_s17   ;;  %s3756_s16 = sphi %s3886_s16, %s4851_s16   ;;  %s3752_s15 = sphi %s3884_s15, %s4844_s15   ;;  %s3748_s30 = sphi %s3882_s30, %s4843_s30   ;;  %s3744_s29 = sphi %s3880_s29, %s4842_s29  }
  0x20   : > { %4770 = sst [smem:[#allocation21_spill]] %s3752_s15  ;;  %s2903_s25 = sadd.s32 4294967294, %s3784_s23  }
  0x21   : > { %4771 = sst [smem:[#allocation22_spill]] %s3756_s16  ;;  %s48_s26 = sadd.s32 1, %s3776_s21 }
  0x22   : > { %4772 = sst [smem:[#allocation23_spill]] %s3764_s18  ;;  %s51_s27 = sadd.s32 1, %s3780_s22 }
  0x23   : > { %4773 = sst [smem:[#allocation24_spill]] %s3768_s19  ;;  %p49_p0 = scmp.ge.s32.totalorder %s48_s26, 2 }
  0x24   : > { %4774 = sst [smem:[#allocation25_spill]] %s3772_s20  ;;  %s58_s28 = sadd.s32 1, %s3764_s18 }
  0x25   : > { %4775 = sst [smem:[#allocation26_spill]] %s3776_s21  ;;  %p65_p1 = scmp.ne.s32.totalorder %s3764_s18, %s3760_s17 }
  0x26   : > { %4776 = sst [smem:[#allocation27_spill]] %s3780_s22  ;;  %p66_p2 = scmp.eq.s32.totalorder %s3784_s23, 0 }
  0x27   : > { %4777 = sst [smem:[#allocation28_spill]] %s3784_s23  ;;  %s4855_s26 = smov (%p49_p0, %s48_s26), 0 }
  0x28   : > { %4778 = sst [smem:[#allocation29_spill]] %s3936_s24  ;;  %s4857_s27 = smov (!%p49_p0, %s51_s27), %s3780_s22 }
  0x29   : > { %4779 = sst [smem:[#allocation30_spill]] %s4855_s26  ;;  %p3953_p3 = por %p66_p2, %p65_p1 }
  0x2a   : > { %p4726_p4 = scmp.ne.s32.totalorder %s3760_s17, %s3756_s16  ;;  %p53_p5 = scmp.ge.s32.totalorder %s4857_s27, 2 }
  0x2b   : > { %p72_p6 = scmp.eq.s32.totalorder %s3936_s24, 0  ;;  %s107_s20 = ssub.s32 %s3776_s21, %s4855_s26 }
  0x2c   : > { %s110_s13 = sadd.s32 1, %s3752_s15  ;;  %s4859_s27 = smov (%p53_p5, %s4857_s27), 0 }
  0x2d   : > { %4781 = sst [smem:[#allocation31_spill]] %s4859_s27  ;;  %p3970_p7 = por %p72_p6, %p4726_p4 }
  0x2e   : > { %p108_p8 = scmp.eq.s32.totalorder %s107_s20, 0  ;;  %s55_s26 = ssub.s32 %s3780_s22, %s4859_s27 }
  0x2f   : > { %s4782_s12 = scalar_select %p3970_p7, 1, 0 }
  0x30   : > { %p117_p9 = scmp.ne.s32.totalorder %s3752_s15, %s3748_s30  ;;  %p56_p10 = scmp.eq.s32.totalorder %s55_s26, 0 }
  0x31   : > { %p123_p11 = scmp.ne.s32.totalorder %s3748_s30, %s3744_s29  ;;  %p433_p0 = scmp.eq.s32.totalorder %s3936_s24, 3 }
  0x32   : > { %s3981_s11 = scalar_select %p108_p8, %s3752_s15, %s110_s13  }
  0x33   : > { %s3984_s9 = scalar_select %p56_p10, %s3764_s18, %s58_s28  }
  0x34   : > { %4783 = sst [smem:[#allocation32_spill]] %s3981_s11  ;;  %p3988_p12 = por %p117_p9, %p66_p2 }
  0x35   : > { %4784 = sst [smem:[#allocation33_spill]] %s3984_s9  ;;  %p3994_p13 = por %p123_p11, %p72_p6 }
  0x36   : > { %p439_p5 = scmp.eq.s32.totalorder %s2903_s25, 3  ;;  %p4734_p4 = scmp.lt.s32.totalorder %s3784_s23, 4 }
  0x37   : > { %s4786_s7 = scalar_select %p3994_p13, 1, 0 }
  0x38   : > { %p4003_p7 = por %p433_p0, %p65_p1  ;;  %p4790_p8 = scmp.ne.s32.totalorder %s3760_s17, %s3756_s16 }
  0x39   : > { %4787 = sst [smem:[#allocation34_spill]] %s4786_s7  ;;  %s4015_s20 = sand.u32 1, %s3764_s18  }
  0x3a   : > { %s4788_s13 = scalar_select %p4003_p7, 1, 0 }
  0x3b   : > { %p4010_p10 = por %p439_p5, %p4790_p8  ;;  %p4021_p2 = pnand %p4734_p4, %p3953_p3 }
  0x3c   : > { %4789 = sst [smem:[#allocation35_spill]] %s4788_s13  ;;  %s4735_s25 = sand.u32 1, %s3784_s23  }
  0x3d   : > { %s4791_s29 = scalar_select %p4010_p10, 1, 0 }
  0x3e   : > { %s4793_s26 = scalar_select %p4021_p2, 1, 0 }
  0x3f   : > { %4792 = sst [smem:[#allocation36_spill]] %s4791_s29  ;;  %s2908_s28 = sshll.u32 %s3780_s22, 4 }
  0x40   : > { %s480_s27 = scalar_lea.vmem [#allocation5], %s4015_s20  ;;  %s4794_s1 = sld [smem:[#allocation38_spill]] }
  0x41   : > { %s487_s9 = sshll.u32 %s480_s27, 4  ;;  %s4037_s14 = scalar_lea.sflag [#allocation6], %s4735_s25  ;;  %s4033_s9 = int_to_ptr.vmem [resolvable:$true] %s487_s9 }
  0x42   : > { %p4739_p3 = pneg %p4021_p2 }
  0x46   : > { %s4031_s13 = scalar_lea.hbm %s4794_s1, %s2908_s28  ;;  %s3471_s27 = scalar_lea.hbm %s4794_s1, 32 }
  0x47   : > { %s3466_s18 = scalar_lea.hbm %s4031_s13, 16  ;;  %p3472_p11 = scmp.lt.u32.totalorder %s4031_s13, %s4794_s1 }
  0x48   : > { %p3467_p1 = scmp.ne.s32.totalorder %s4031_s13, %s3466_s18  ;;  %p3473_p0 = scmp.lt.u32.totalorder %s3471_s27, %s3466_s18 }
  0x49   : > { %p3475_p8 = scmp.lt.u32.totalorder %s3466_s18, %s4031_s13 }
  0x4a   : > { %p3469_p6 = pnand %p4739_p3, %p3467_p1  ;;  %p3474_p5 = por %p3473_p0, %p3472_p11 }
  0x4c   : > { %p3470_p9 = pneg %p3469_p6  ;;  %p3476_p4 = por %p3475_p8, %p3474_p5 }
  0x4e   : > { %p3477_p10 = pnand %p3476_p4, %p3470_p9 }
  0x50   : > { %3480 = shalt.err (!%p3477_p10)
}
  0x51   : > { %s3481_s25 = scalar_lea.vmem %s4033_s9, 16  ;;  %s3786_s11 = smov [#allocation5]  }
  0x52   : > { %p3482_p1 = scmp.ne.s32.totalorder %s4033_s9, %s3481_s25  ;;  %s3486_s16 = sshll.u32 %s3786_s11, 4  ;;  %s3487_s16 = int_to_ptr.vmem [resolvable:$false] %s3486_s16 }
  0x53   : > { %s3488_s29 = scalar_lea.vmem %s3487_s16, 32  ;;  %p3489_p13 = scmp.lt.s32.totalorder %s4033_s9, %s3487_s16 }
  0x54   : > { %p3484_p6 = pnand %p3482_p1, %p4739_p3  ;;  %p3490_p11 = scmp.lt.s32.totalorder %s3488_s29, %s3481_s25 }
  0x56   : > { %p3485_p7 = pneg %p3484_p6  ;;  %p3491_p0 = por %p3490_p11, %p3489_p13 }
  0x58   : > { %p3492_p5 = pnand %p3491_p0, %p3485_p7 }
  0x5a   : > { %3495 = shalt.err (!%p3492_p5)
}
  0x5b   : > { %3207 = dma.hbm_to_vmem [thread:$0]  (!%p4021_p2), %s4031_s13, 16, %s4033_s9, %s4037_s14  }
  0x5c   : > { %p4795_p4 = scmp.lt.s32.totalorder %s3784_s23, 4  ;;  %p2919_p7 = scmp.ge.s32.totalorder %s3784_s23, 1 }
  0x5d   : > { %p626_p13 = scmp.lt.s32.totalorder %s3784_s23, 5  ;;  %s4076_s25 = sand.u32 1, %s3752_s15  }
  0x5e   : > { %p4069_p10 = pnand %p4795_p4, %p3988_p12  ;;  %s2910_s28 = sshll.u32 %s4076_s25, 6 }
  0x5f   : > { %p4078_p9 = pnand %p2919_p7, %p626_p13  ;;  %s3046_s11 = sshll.u32 %s3776_s21, 10 }
  0x60   : > { %s4796_s18 = scalar_select %p4069_p10, 1, 0 }
  0x61   : > { %s4797_s27 = scalar_select %p4078_p9, 1, 0 }
  0x62   : > { %s4798_s4 = sld [smem:[#allocation41_spill]]  ;;  %s526_s13 = scalar_lea.vmem [#allocation8], %s2910_s28 }
  0x63   : > { %s533_s29 = sshll.u32 %s526_s13, 4  ;;  %s4799_s1 = sand.u32 1, %s3784_s23   ;;  %s4089_s29 = int_to_ptr.vmem [resolvable:$true] %s533_s29 }
  0x64   : > { %s4093_s15 = scalar_lea.sflag [#allocation9], %s4799_s1  ;;  %p4099_p8 = pneg %p4069_p10 }
  0x68   : > { %s4087_s3 = scalar_lea.hbm %s4798_s4, %s3046_s11  ;;  %s3501_s28 = scalar_lea.hbm %s4798_s4, 2048 }
  0x69   : > { %s3496_s6 = scalar_lea.hbm %s4087_s3, 1024  ;;  %p3502_p11 = scmp.lt.u32.totalorder %s4087_s3, %s4798_s4 }
  0x6a   : > { %p3497_p12 = scmp.ne.s32.totalorder %s4087_s3, %s3496_s6  ;;  %p3503_p0 = scmp.lt.u32.totalorder %s3501_s28, %s3496_s6 }
  0x6b   : > { %p3505_p4 = scmp.lt.u32.totalorder %s3496_s6, %s4087_s3 }
  0x6c   : > { %p3499_p1 = pnand %p4099_p8, %p3497_p12  ;;  %p3504_p5 = por %p3503_p0, %p3502_p11 }
  0x6e   : > { %p3500_p6 = pneg %p3499_p1  ;;  %p3506_p7 = por %p3505_p4, %p3504_p5 }
  0x70   : > { %p3507_p13 = pnand %p3506_p7, %p3500_p6 }
  0x72   : > { %3510 = shalt.err (!%p3507_p13)
}
  0x73   : > { %s3511_s1 = scalar_lea.vmem %s4089_s29, 1024  ;;  %s3787_s11 = smov [#allocation8]  }
  0x74   : > { %p3512_p12 = scmp.ne.s32.totalorder %s4089_s29, %s3511_s1  ;;  %s3516_s16 = sshll.u32 %s3787_s11, 4  ;;  %s3517_s16 = int_to_ptr.vmem [resolvable:$false] %s3516_s16 }
  0x75   : > { %s3518_s9 = scalar_lea.vmem %s3517_s16, 2048  ;;  %p3519_p9 = scmp.lt.s32.totalorder %s4089_s29, %s3517_s16 }
  0x76   : > { %p3514_p1 = pnand %p3512_p12, %p4099_p8  ;;  %p3520_p2 = scmp.lt.s32.totalorder %s3518_s9, %s3511_s1 }
  0x78   : > { %p3515_p3 = pneg %p3514_p1  ;;  %p3521_p11 = por %p3520_p2, %p3519_p9 }
  0x7a   : > { %p3522_p0 = pnand %p3521_p11, %p3515_p3 }
  0x7c   : > { %3525 = shalt.err (!%p3522_p0)
}
  0x7d   : > { %s3788_s6 = smov 64   ;;  %s3789_s28 = smov 4  }
  0x7e   : > { %3213 = dma.hbm_to_vmem [thread:$0]  (!%p4069_p10), %s4087_s3, 1024, %s4089_s29, %s4093_s15, %s3788_s6, %s3788_s6, %s3789_s28  }
  0x7f   : > { %s2906_s13 = sshll.u32 %s4015_s20, 3  ;;  %s2907_s1 = sshll.u32 %s3780_s22, 7 }
  0x80   : > { %s4801_s0 = sld [smem:[#allocation37_spill]]  ;;  %s463_s4 = scalar_lea.vmem [#allocation2], %s2906_s13 }
  0x81   : > { %s470_s23 = sshll.u32 %s463_s4, 4  ;;  %s3183_s19 = smul.u32 192, %s4076_s25  ;;  %s4134_s23 = int_to_ptr.vmem [resolvable:$true] %s470_s23 }
  0x82   : > { %s3184_s7 = smul.u32 3072, %s3776_s21  ;;  %s460_s30 = scalar_lea.sflag [#allocation3], %s4015_s20 }
  0x83   : > { %p4802_p3 = scmp.ne.s32.totalorder %s4793_s26, 0 }
  0x85   : > { %p4803_p9 = pneg %p4802_p3 }
  0x86   : > { %s4131_s9 = scalar_lea.hbm %s4801_s0, %s2907_s1  ;;  %s3531_s1 = scalar_lea.hbm %s4801_s0, 256 }
  0x87   : > { %s3526_s24 = scalar_lea.hbm %s4131_s9, 128  ;;  %p3532_p4 = scmp.lt.u32.totalorder %s4131_s9, %s4801_s0 }
  0x88   : > { %p3527_p2 = scmp.ne.s32.totalorder %s4131_s9, %s3526_s24  ;;  %p3533_p7 = scmp.lt.u32.totalorder %s3531_s1, %s3526_s24 }
  0x89   : > { %p3535_p12 = scmp.lt.u32.totalorder %s3526_s24, %s4131_s9 }
  0x8a   : > { %p3529_p6 = pnand %p3527_p2, %p4803_p9  ;;  %p3534_p13 = por %p3533_p7, %p3532_p4 }
  0x8c   : > { %p3530_p5 = pneg %p3529_p6  ;;  %p3536_p1 = por %p3535_p12, %p3534_p13 }
  0x8e   : > { %p3537_p11 = pnand %p3536_p1, %p3530_p5 }
  0x90   : > { %3540 = shalt.err (!%p3537_p11)
}
  0x91   : > { %s3541_s4 = scalar_lea.vmem %s4134_s23, 128  ;;  %p4804_p2 = pmov %p4803_p9 }
  0x92   : > { %p3542_p0 = scmp.ne.s32.totalorder %s4134_s23, %s3541_s4  ;;  %s3790_s20 = smov [#allocation2]  }
  0x93   : > { %s3546_s13 = sshll.u32 %s3790_s20, 4  ;;  %s3547_s13 = int_to_ptr.vmem [resolvable:$false] %s3546_s13 }
  0x94   : > { %p3544_p9 = pnand %p3542_p0, %p4804_p2  ;;  %s3548_s3 = scalar_lea.vmem %s3547_s13, 256 }
  0x95   : > { %p3549_p10 = scmp.lt.s32.totalorder %s4134_s23, %s3547_s13  ;;  %p3550_p4 = scmp.lt.s32.totalorder %s3548_s3, %s3541_s4 }
  0x96   : > { %p3545_p6 = pneg %p3544_p9 }
  0x97   : > { %p3551_p7 = por %p3550_p4, %p3549_p10 }
  0x99   : > { %p3552_p13 = pnand %p3551_p7, %p3545_p6 }
  0x9b   : > { %3555 = shalt.err (!%p3552_p13)
}
  0x9c   : > { %3204 = dma.hbm_to_vmem [thread:$0]  (!%p4802_p3), %s4131_s9, 128, %s4134_s23, %s460_s30  }
  0x9d   : > { %s4805_s2 = sld [smem:[#allocation39_spill]]  ;;  %s498_s11 = scalar_lea.vmem [#allocation7], %s3183_s19 }
  0x9e   : > { %s505_s16 = sshll.u32 %s498_s11, 4  ;;  %s4170_s16 = int_to_ptr.vmem [resolvable:$true] %s505_s16 }
  0xa3   : > { %s4166_s1 = scalar_lea.hbm %s4805_s2, %s3184_s7  ;;  %s3561_s9 = scalar_lea.hbm %s4805_s2, 6144 }
  0xa4   : > { %s3556_s26 = scalar_lea.hbm %s4166_s1, 3072  ;;  %p3562_p12 = scmp.lt.u32.totalorder %s4166_s1, %s4805_s2 }
  0xa5   : > { %p3557_p10 = scmp.ne.s32.totalorder %s4166_s1, %s3556_s26  ;;  %p3563_p1 = scmp.lt.u32.totalorder %s3561_s9, %s3556_s26 }
  0xa6   : > { %p3565_p0 = scmp.lt.u32.totalorder %s3556_s26, %s4166_s1 }
  0xa7   : > { %p3559_p5 = pnand %p3557_p10, %p4099_p8  ;;  %p3564_p11 = por %p3563_p1, %p3562_p12 }
  0xa9   : > { %p3560_p3 = pneg %p3559_p5  ;;  %p3566_p2 = por %p3565_p0, %p3564_p11 }
  0xab   : > { %p3567_p9 = pnand %p3566_p2, %p3560_p3 }
  0xad   : > { %3570 = shalt.err (!%p3567_p9)
}
  0xae   : > { %s3571_s19 = scalar_lea.vmem %s4170_s16, 3072  ;;  %s3791_s20 = smov [#allocation7]  }
  0xaf   : > { %p3572_p6 = scmp.ne.s32.totalorder %s4170_s16, %s3571_s19  ;;  %s3576_s13 = sshll.u32 %s3791_s20, 4  ;;  %s3577_s13 = int_to_ptr.vmem [resolvable:$false] %s3576_s13 }
  0xb0   : > { %s3578_s3 = scalar_lea.vmem %s3577_s13, 6144  ;;  %p3579_p13 = scmp.lt.s32.totalorder %s4170_s16, %s3577_s13 }
  0xb1   : > { %p3574_p4 = pnand %p3572_p6, %p4099_p8  ;;  %p3580_p10 = scmp.lt.s32.totalorder %s3578_s3, %s3571_s19 }
  0xb3   : > { %p3575_p7 = pneg %p3574_p4  ;;  %p3581_p5 = por %p3580_p10, %p3579_p13 }
  0xb5   : > { %p3582_p12 = pnand %p3581_p5, %p3575_p7 }
  0xb7   : > { %3585 = shalt.err (!%p3582_p12)
}
  0xb8   : > { %s3792_s24 = smov 192   ;;  %s3793_s29 = smov 12  }
  0xb9   : > { %p4806_p3 = scmp.ne.s32.totalorder %s4796_s18, 0  ;;  %s2913_s11 = sshll.u32 %s4076_s25, 8 }
  0xba   : > { %s3047_s26 = sshll.u32 %s3776_s21, 12  ;;  %s4807_s8 = sld [smem:[#allocation45_spill]] }
  0xbb   : > { %3210 = dma.hbm_to_vmem [thread:$0]  (!%p4806_p3), %s4166_s1, 3072, %s4170_s16, %s4037_s14, %s3792_s24, %s3792_s24, %s3793_s29  }
  0xbc   : > { %s565_s7 = scalar_lea.vmem [#allocation10], %s2913_s11 }
  0xbd   : > { %s572_s4 = sshll.u32 %s565_s7, 4  ;;  %s4205_s4 = int_to_ptr.vmem [resolvable:$true] %s572_s4 }
  0xc0   : > { %s4201_s9 = scalar_lea.hbm %s4807_s8, %s3047_s26  ;;  %s3591_s16 = scalar_lea.hbm %s4807_s8, 8192 }
  0xc1   : > { %s3586_s19 = scalar_lea.hbm %s4201_s9, 4096  ;;  %p3592_p2 = scmp.lt.u32.totalorder %s4201_s9, %s4807_s8 }
  0xc2   : > { %p3587_p1 = scmp.ne.s32.totalorder %s4201_s9, %s3586_s19  ;;  %p3593_p9 = scmp.lt.u32.totalorder %s3591_s16, %s3586_s19 }
  0xc3   : > { %p3595_p4 = scmp.lt.u32.totalorder %s3586_s19, %s4201_s9 }
  0xc4   : > { %p3589_p11 = pnand %p3587_p1, %p4099_p8  ;;  %p3594_p6 = por %p3593_p9, %p3592_p2 }
  0xc6   : > { %p3590_p0 = pneg %p3589_p11  ;;  %p3596_p7 = por %p3595_p4, %p3594_p6 }
  0xc8   : > { %p3597_p13 = pnand %p3596_p7, %p3590_p0 }
  0xca   : > { %3600 = shalt.err (!%p3597_p13)
}
  0xcb   : > { %s3601_s3 = scalar_lea.vmem %s4205_s4, 4096  ;;  %s3794_s24 = smov [#allocation10]  }
  0xcc   : > { %p3602_p10 = scmp.ne.s32.totalorder %s4205_s4, %s3601_s3  ;;  %s3606_s29 = sshll.u32 %s3794_s24, 4  ;;  %s3607_s29 = int_to_ptr.vmem [resolvable:$false] %s3606_s29 }
  0xcd   : > { %s3608_s30 = scalar_lea.vmem %s3607_s29, 8192  ;;  %p3609_p1 = scmp.lt.s32.totalorder %s4205_s4, %s3607_s29 }
  0xce   : > { %p3604_p5 = pnand %p3602_p10, %p4099_p8  ;;  %p3610_p11 = scmp.lt.s32.totalorder %s3608_s30, %s3601_s3 }
  0xd0   : > { %p3605_p12 = pneg %p3604_p5  ;;  %p3611_p2 = por %p3610_p11, %p3609_p1 }
  0xd2   : > { %p3612_p9 = pnand %p3611_p2, %p3605_p12 }
  0xd4   : > { %3615 = shalt.err (!%p3612_p9)
}
  0xd5   : > { %s3795_s23 = smov 256   ;;  %s3796_s7 = smov 16  }
  0xd6   : > { %3216 = dma.hbm_to_vmem [thread:$0]  (!%p4806_p3), %s4201_s9, 4096, %s4205_s4, %s4093_s15, %s3795_s23, %s3795_s23, %s3796_s7  }
  0xd7   : > { %s4808_s10 = sld [smem:[#allocation47_spill]]  ;;  %s593_s16 = scalar_lea.vmem [#allocation11], %s2913_s11 }
  0xd8   : > { %s600_s20 = sshll.u32 %s593_s16, 4  ;;  %s590_s13 = scalar_lea.sflag [#allocation12], %s4076_s25  ;;  %s4238_s20 = int_to_ptr.vmem [resolvable:$true] %s600_s20 }
  0xdd   : > { %s4234_s1 = scalar_lea.hbm %s4808_s10, %s3047_s26  ;;  %s3621_s26 = scalar_lea.hbm %s4808_s10, 8192 }
  0xde   : > { %s3616_s3 = scalar_lea.hbm %s4234_s1, 4096  ;;  %p3622_p7 = scmp.lt.u32.totalorder %s4234_s1, %s4808_s10 }
  0xdf   : > { %p3617_p0 = scmp.ne.s32.totalorder %s4234_s1, %s3616_s3  ;;  %p3623_p13 = scmp.lt.u32.totalorder %s3621_s26, %s3616_s3 }
  0xe0   : > { %p3625_p5 = scmp.lt.u32.totalorder %s3616_s3, %s4234_s1 }
  0xe1   : > { %p3619_p6 = pnand %p3617_p0, %p4099_p8  ;;  %p3624_p10 = por %p3623_p13, %p3622_p7 }
  0xe3   : > { %p3620_p4 = pneg %p3619_p6  ;;  %p3626_p12 = por %p3625_p5, %p3624_p10 }
  0xe5   : > { %p3627_p1 = pnand %p3626_p12, %p3620_p4 }
  0xe7   : > { %3630 = shalt.err (!%p3627_p1)
}
  0xe8   : > { %s3631_s11 = scalar_lea.vmem %s4238_s20, 4096  ;;  %s3797_s29 = smov [#allocation11]  }
  0xe9   : > { %p3632_p11 = scmp.ne.s32.totalorder %s4238_s20, %s3631_s11  ;;  %s3636_s30 = sshll.u32 %s3797_s29, 4  ;;  %s3637_s30 = int_to_ptr.vmem [resolvable:$false] %s3636_s30 }
  0xea   : > { %s3638_s23 = scalar_lea.vmem %s3637_s30, 8192  ;;  %p3639_p0 = scmp.lt.s32.totalorder %s4238_s20, %s3637_s30 }
  0xeb   : > { %p3634_p2 = pnand %p3632_p11, %p4099_p8  ;;  %p3640_p6 = scmp.lt.s32.totalorder %s3638_s23, %s3631_s11 }
  0xed   : > { %p3635_p9 = pneg %p3634_p2  ;;  %p3641_p7 = por %p3640_p6, %p3639_p0 }
  0xef   : > { %p3642_p13 = pnand %p3641_p7, %p3635_p9 }
  0xf1   : > { %3645 = shalt.err (!%p3642_p13)
}
  0xf2   : > { %3219 = dma.hbm_to_vmem [thread:$0]  (!%p4806_p3), %s4234_s1, 4096, %s4238_s20, %s590_s13, %s3788_s6, %s3788_s6, %s3789_s28  }
  0xf3   : > { %p4809_p8 = scmp.ne.s32.totalorder %s4797_s27, 0 }
  0xf4   : > { %s4270_s5 = sand.u32 (!%p4809_p8), 1, %s3760_s17   ;;  %p4810_p4 = scmp.ne.s32.totalorder (!%p4809_p8), %s4782_s12, 0 }
  0xf5   : > { %630 = sbr.rel (%p4809_p8) target bundleno = 2898 (0xb52), region = 76  ;;  %s4751_s7 = sshll.u32 (!%p4809_p8), %s4270_s5, 3 }
  0xf6   : > { %s633_s18 = scalar_lea.sflag (!%p4809_p8), [#allocation3], %s4270_s5  ;;  %s4276_s19 = scalar_lea.vmem (!%p4809_p8), [#allocation2], %s4751_s7 }
  0xfc   : > { %3719 = dma.done.wait (%p4810_p4), %s633_s18, 128  }
  0xfd   : > { %3721 = vsyncadd (%p4810_p4), %s633_s18, 4294967168  ;;  %s4811_s25 = sld [smem:[#allocation29_spill]] }
 0x103   : > { %s641_s27 = sand.u32 1, %s4811_s25  }
 0x104   : > { %s642_s6 = scalar_lea.sflag [#allocation6], %s641_s27 }
 0x105   : > { %3723 = dma.done.wait (%p4810_p4), %s642_s6, 16  }
 0x106   : > { %3725 = vsyncadd (%p4810_p4), %s642_s6, 4294967280  ;;  %s4812_s14 = sld [smem:[#allocation20_spill]]  ;;  %s4813_s1 = sld [smem:[#allocation34_spill]] }
 0x10c   : > { %s651_s16 = sand.u32 1, %s4812_s14   ;;  %p4814_p3 = scmp.ne.s32.totalorder %s4813_s1, 0 }
 0x10d   : > { %s3185_s20 = smul.u32 192, %s651_s16 }
 0x10f   : > { %s4289_s13 = scalar_lea.vmem [#allocation7], %s3185_s20 }
 0x110   : > { %3727 = dma.done.wait (%p4814_p3), %s642_s6, 3072  }
 0x111   : > { %3729 = vsyncadd (%p4814_p3), %s642_s6, 4294964224  ;;  %s2921_s3 = sshll.u32 %s651_s16, 6  ;;  %s659_s15 = scalar_lea.sflag [#allocation9], %s641_s27 }
 0x112   : > { %s4295_s9 = scalar_lea.vmem [#allocation8], %s2921_s3 }
 0x113   : > { %3731 = dma.done.wait (%p4814_p3), %s659_s15, 5120  }
 0x114   : > { %3733 = vsyncadd (%p4814_p3), %s659_s15, 4294962176  ;;  %s2922_s12 = sshll.u32 %s651_s16, 8  ;;  %s677_s4 = scalar_lea.sflag [#allocation12], %s651_s16 }
 0x115   : > { %s4301_s26 = scalar_lea.vmem [#allocation10], %s2922_s12  ;;  %s4303_s24 = scalar_lea.vmem [#allocation11], %s2922_s12 }
 0x116   : > { %3735 = dma.done.wait (%p4814_p3), %s677_s4, 4096  }
 0x117   : > { %3737 = vsyncadd (%p4814_p3), %s677_s4, 4294963200  ;;  %s4815_s11 = sld [smem:[#allocation24_spill]]  ;;  %s4816_s25 = sld [smem:[#allocation42_spill]] }
 0x118   : > { %s4819_s7 = sld [smem:[#allocation40_spill]]  ;;  %s4820_s22 = sld [smem:[#allocation46_spill]] }
 0x119   : > { %s4822_s16 = sld [smem:[#allocation49_spill]]  ;;  %s4823_s12 = sld [smem:[#allocation50_spill]] }
 0x11d   : > { %p775_p10 = scmp.lt.s32.totalorder %s4815_s11, 1  ;;  %p2926_p5 = scmp.ne.s32.totalorder %s4815_s11, 0 }
 0x11e   : > { %v806_v0 = vld [vmem:[%s4276_s19] sm:$0xff] (!%p2926_p5) }
 0x11f   : > { %s4311_s29 = scalar_select %p775_p10, %s4815_s11, 1 }
 0x121   : > { %s3186_s30 = smul.u32 3, %s4311_s29  ;;  %s781_s27 = scalar_lea.vmem %s4816_s25, %s4311_s29 }
 0x122   : > { %s2925_s2 = sshll.u32 %s4311_s29, 2  ;;  %s4821_s25 = sld [smem:[#allocation48_spill]] }
 0x123   : > { %s4329_s0 = scalar_lea.vmem %s4819_s7, %s3186_s30  ;;  %s4335_s21 = scalar_lea.vmem %s4820_s22, %s2925_s2 }
 0x124   : > { %s797_s20 = scalar_lea.vmem %s4822_s16, %s4311_s29  ;;  %s800_s28 = scalar_lea.vmem %s4823_s12, %s4311_s29 }
 0x125   : > { %s4824_s7 = sshll.u32 %s4270_s5, 3  ;;  %805 = sbr.rel (%p2926_p5) target bundleno = 300 (0x12c), region = 104 }
 0x126   : > { %s4351_s30 = scalar_lea.vmem [#allocation13], %s4824_s7 }
 0x127   : > { %807 = vst [vmem:[%s4351_s30] sm:$0xff] (!%p2926_p5), %v806_v0 }
 0x128   : > { %s794_s6 = scalar_lea.vmem %s4821_s25, %s4311_s29 }
 0x12c PF: > { %v3326_v1 = vld [vmem:[%s4289_s13 + $0x4] ss:$12 sps:$4 sm:$0xff]   ;;  %v3328_v2 = vld [vmem:[%s4289_s13] ss:$12 sps:$4 sm:$0xff]   ;;  %v3798_v3 = vmov 0   ;;  %v3799_v20 = vmov 0.0   ;;  %v844_v25 = vlaneseq }
 0x12d   : > { %1019 = vmatprep.mubr.bf16.mxu0 %v3798_v3  ;;  %987 = vmatprep.subr.bf16.mxu0 %v3326_v1  ;;  %v3329_v4 = vld [vmem:[%s4289_s13 + $0x1c] ss:$12 sps:$4 sm:$0xff]   ;;  %v3331_v5 = vld [vmem:[%s4289_s13 + $0x18] ss:$12 sps:$4 sm:$0xff]   ;;  %v3332_v6 = vld [vmem:[%s4289_s13 + $0x34] ss:$12 sps:$4 sm:$0xff]  }
 0x12e   : > { %988 = vmatpush1.bf16.msra.mxu0 %v3328_v2  ;;  %v3334_v7 = vld [vmem:[%s4289_s13 + $0x30] ss:$12 sps:$4 sm:$0xff]   ;;  %v3335_v8 = vld [vmem:[%s4289_s13 + $0x4c] ss:$12 sps:$4 sm:$0xff]   ;;  %v3337_v9 = vld [vmem:[%s4289_s13 + $0x48] ss:$12 sps:$4 sm:$0xff]   ;;  %3119 = vmatprep.subr.bf16.mxu1 %v3799_v20 }
 0x12f   : > { %989 = vmatprep.subr.bf16.mxu0 %v3329_v4  ;;  %v3338_v10 = vld [vmem:[%s4289_s13 + $0x64] ss:$12 sps:$4 sm:$0xff]   ;;  %v3340_v11 = vld [vmem:[%s4289_s13 + $0x60] ss:$12 sps:$4 sm:$0xff]   ;;  %v3341_v12 = vld [vmem:[%s4289_s13 + $0x7c] ss:$12 sps:$4 sm:$0xff]  }
 0x130   : > { %v3343_v13 = vld [vmem:[%s4289_s13 + $0x78] ss:$12 sps:$4 sm:$0xff]   ;;  %v3344_v14 = vld [vmem:[%s4289_s13 + $0x94] ss:$12 sps:$4 sm:$0xff]   ;;  %v3346_v15 = vld [vmem:[%s4289_s13 + $0x90] ss:$12 sps:$4 sm:$0xff]  }
 0x131   : > { %v3347_v16 = vld [vmem:[%s4289_s13 + $0xac] ss:$12 sps:$4 sm:$0xff]   ;;  %v3349_v17 = vld [vmem:[%s4289_s13 + $0xa8] ss:$12 sps:$4 sm:$0xff]   ;;  %v3353_v24 = vld [vmem:[%s4289_s13 + $0x50] ss:$12 sps:$4 sm:$0xff]  }
 0x132   : > { %990 = vmatpush1.bf16.msra.mxu0 %v3331_v5  ;;  %v4374_v18 = vld [vmem:[%s4351_s30] sm:$0xff]  ;;  %v4389_v27 = vshrl.u32 %v844_v25, 7  ;;  %v3357_v39 = vld [vmem:[%s4289_s13 + $0xb0] ss:$12 sps:$4 sm:$0xff]   ;;  %vm3801_vm0 = vmmov 0   ;;  %vm1439_vm1 = vcmask 523264  }
 0x133   : > { %991 = vmatprep.subr.bf16.mxu0 %v3332_v6  ;;  %v809_v19 = vpack.c.bf16 %v4374_v18, %v4374_v18  ;;  %v3350_v21 = vld [vmem:[%s4289_s13 + $0x8] ss:$12 sps:$4 sm:$0xff]   ;;  %v3351_v22 = vld [vmem:[%s4289_s13 + $0x20] ss:$12 sps:$4 sm:$0xff]   ;;  %v3352_v23 = vld [vmem:[%s4289_s13 + $0x38] ss:$12 sps:$4 sm:$0xff]   ;;  %3135 = vmatprep.mubr.msk.bf16.mxu1 %vm3801_vm0, %v3799_v20 }
 0x134   : > { %3120 = vmatpush3.bf16.msra.mxu1 %v3350_v21  ;;  %v3354_v26 = vld [vmem:[%s4289_s13 + $0x68] ss:$12 sps:$4 sm:$0xff]   ;;  %v850_v28 = vsub.s32 1, %v4389_v27  ;;  %v3355_v29 = vld [vmem:[%s4289_s13 + $0x80] ss:$12 sps:$4 sm:$0xff]   ;;  %v846_v31 = vsub.s32 0, %v4389_v27 }
 0x135   : > { %3121 = vmatprep.subr.bf16.mxu1 %v3799_v20  ;;  %v4395_v30 = vld [vmem:[%s4329_s0] sm:$0x7]  ;;  %v3356_v33 = vld [vmem:[%s4289_s13 + $0x98] ss:$12 sps:$4 sm:$0xff]   ;;  %s3800_s0 = smov 64   ;;  %s4825_s2 = scalar_lea.vmem [#allocation5], %s4270_s5 }
 0x136   : > { %992 = vmatpush1.bf16.msra.mxu0 %v3334_v7  ;;  %v851_v32 = vrot.slane %v4395_v30, %v850_v28  ;;  %v847_v36 = vrot.slane %v4395_v30, %v846_v31  ;;  %v3802_v42 = vmov 1983009808   ;;  %v3803_v45 = vmov 1934713408   ;;  %s4829_s16 = sld [smem:[#allocation44_spill]]  ;;  %s4832_s23 = sld [smem:[#allocation25_spill]] }
 0x137   : > { %993 = vmatprep.subr.bf16.mxu0 %v3335_v8  ;;  %v1074_v43 = vunpack.c.l.s4 %v3802_v42  ;;  %v1105_v46 = vunpack.c.l.s4 %v3803_v45  ;;  %vm1532_vm2 = vcmask 64512   ;;  %vm1562_vm3 = vcmask 1043456   ;;  %s4833_s18 = sld [smem:[#allocation35_spill]] }
 0x138   : > { %3122 = vmatpush3.bf16.msra.mxu1 %v3351_v22  ;;  %s4836_s10 = sld [smem:[#allocation51_spill]] }
 0x139   : > { %3123 = vmatprep.subr.bf16.mxu1 %v3799_v20  ;;  %v1075_v44 = vunpack.c.0.s8 %v1074_v43  ;;  %v1106_v48 = vunpack.c.0.s8 %v1105_v46 }
 0x13a   : > { %994 = vmatpush1.bf16.msra.mxu0 %v3337_v9 }
 0x13b   : > { %995 = vmatprep.subr.bf16.mxu0 %v3338_v10  ;;  %v4418_v47 = vsub.s32 %v1075_v44, %v4389_v27  ;;  %v4422_v51 = vsub.s32 %v1106_v48, %v4389_v27 }
 0x13c   : > { %3124 = vmatpush3.bf16.msra.mxu1 %v3352_v23  ;;  %s4830_s12 = scalar_lea.vmem %s4829_s16, %s4311_s29  ;;  %s3043_s7 = sshll.u32 %s4832_s23, 7 }
 0x13d   : > { %3125 = vmatprep.subr.bf16.mxu1 %v3799_v20  ;;  %p4837_p1 = scmp.ne.s32.totalorder %s4833_s18, 0 }
 0x13e   : > { %996 = vmatpush1.bf16.msra.mxu0 %v3340_v11  ;;  %s4645_s22 = scalar_lea.hbm %s4836_s10, %s3043_s7 }
 0x13f   : > { %997 = vmatprep.subr.bf16.mxu0 %v3341_v12 }
 0x140   : > { %3126 = vmatpush3.bf16.msra.mxu1 %v3353_v24 }
 0x141   : > { %3127 = vmatprep.subr.bf16.mxu1 %v3799_v20 }
 0x142   : > { %998 = vmatpush1.bf16.msra.mxu0 %v3343_v13 }
 0x143   : > { %999 = vmatprep.subr.bf16.mxu0 %v3344_v14 }
 0x144   : > { %3128 = vmatpush3.bf16.msra.mxu1 %v3354_v26 }
 0x145   : > { %3129 = vmatprep.subr.bf16.mxu1 %v3799_v20 }
 0x146   : > { %1000 = vmatpush1.bf16.msra.mxu0 %v3346_v15 }
 0x147   : > { %1001 = vmatprep.subr.bf16.mxu0 %v3347_v16 }
 0x148   : > { %3130 = vmatpush3.bf16.msra.mxu1 %v3355_v29 }
 0x149   : > { %3131 = vmatprep.subr.bf16.mxu1 %v3799_v20 }
 0x14a   : > { %1002 = vmatpush1.bf16.msra.mxu0 %v3349_v17 }
 0x14b   : > { %3163 = vmatprep.subr.bf16.mxu0 %v3799_v20 }
 0x14c   : > { %3132 = vmatpush3.bf16.msra.mxu1 %v3356_v33 }
 0x14d   : > { %1020 = vmatmul.mubr.bf16.vlgmr.msra.gmra.mrb[0].mxu0 %v809_v19  ;;  %3133 = vmatprep.subr.bf16.mxu1 %v3799_v20 }
 0x14e   : > { %3179 = vmatprep.mubr.msk.bf16.mxu0 %vm3801_vm0, %v3799_v20 }
 0x150   : > { %3134 = vmatpush3.bf16.msra.mxu1 %v3357_v39 }
 0x151   : > { %3139 = vmatprep.subr.bf16.mxu1 %v3799_v20 }
 0x153   : > { %3136 = vmatmul.mubr.bf16.vlgmr.msra.gmra.mrb[0].mxu1 %v809_v19 }
 0x154   : > { %3141 = vmatprep.mubr.msk.bf16.mxu1 %vm3801_vm0, %v3799_v20 }
 0x220   : > { %v1021_v34 = vpop.f32.mrb[0].mxu0 }
 0x221   : > { %v1023_v35 = vpop.f32.mrb[1].mxu0  ;;  %v1022_v41 = vadd.f32 %v1021_v34, %v847_v36 }
 0x222   : > { %v1024_v37 = vadd.f32 %v1023_v35, %v851_v32  ;;  %v1025_v38 = vpop.f32.mrb[2].mxu0 }
 0x223   : > { %v1026_v40 = vpop.f32.mrb[3].mxu0  ;;  %v1072_v59 = vcombine.high %v1022_v41, %v3799_v20  ;;  %v1079_v1 = vrot.slane %v1022_v41, %v4418_v47 }
 0x224   : > { %1189 = vrot.lane.b32.xlu0 %v1024_v37, %s3800_s0  ;;  %v1192_v49 = vcombine.high %v1024_v37, %v3799_v20  ;;  %v1199_v52 = vrot.slane %v1024_v37, %v4418_v47 }
 0x225   : > { %v1086_v9 = vrot.slane %v1072_v59, %v4418_v47 }
 0x226   : > { %v1206_v55 = vrot.slane %v1192_v49, %v4418_v47  ;;  %v1062_v59 = vpop.f32.mrb[0].mxu1 }
 0x228   : > { %1069 = vrot.lane.b32.xlu0 %v1022_v41, %s3800_s0 }
 0x296   : > { %v1190_v50 = vpop.permute.xlu0 %1189 }
 0x297   : > { %v1207_v53 = vcombine.high %v1190_v50, %v3799_v20  ;;  %v1214_v54 = vrot.slane %v1190_v50, %v4418_v47 }
 0x299   : > { %v1221_v56 = vrot.slane %v1207_v53, %v4418_v47  ;;  %v1222_v57 = vcombine.low %v1199_v52, %v1214_v54  ;;  %v1223_v58 = vcombine.high %v1199_v52, %v1214_v54 }
 0x29a   : > { %v1070_v60 = vpop.permute.xlu0 %1069 }
 0x29b   : > { %v1230_v61 = vrot.slane %v1222_v57, %v4422_v51  ;;  %v1237_v62 = vrot.slane %v1223_v58, %v4422_v51  ;;  %v1238_v63 = vcombine.low %v1206_v55, %v1221_v56  ;;  %v1239_v0 = vcombine.high %v1206_v55, %v1221_v56 }
 0x29c   : > { %v1087_v2 = vcombine.high %v1070_v60, %v3799_v20  ;;  %v1094_v4 = vrot.slane %v1070_v60, %v4418_v47  ;;  %v3137_v60 = vpop.f32.mrb[1].mxu1 }
 0x29d   : > { %v1246_v5 = vrot.slane %v1238_v63, %v4422_v51  ;;  %v1253_v6 = vrot.slane %v1239_v0, %v4422_v51  ;;  %v1258_v7 = vcombine.low %v1230_v61, %v1237_v62  ;;  %v2953_v8 = vcombine.high %v1230_v61, %v1237_v62  ;;  %v1065_v61 = vpop.f32.mrb[2].mxu1  ;;  %v2957_v63 = vld [vmem:[%s4825_s2] ss:$0 sm:$0xff] }
 0x29e   : > { %v1101_v10 = vrot.slane %v1087_v2, %v4418_v47  ;;  %v1102_v11 = vcombine.low %v1079_v1, %v1094_v4  ;;  %v1103_v12 = vcombine.high %v1079_v1, %v1094_v4  ;;  %v3138_v62 = vpop.f32.mrb[3].mxu1 }
 0x29f   : > { %v1265_v13 = vrot.slane %v1258_v7, %v4418_v47  ;;  %v1273_v14 = vrot.slane %v2953_v8, %v4418_v47  ;;  %v1274_v15 = vcombine.low %v1246_v5, %v1253_v6  ;;  %v2954_v16 = vcombine.high %v1246_v5, %v1253_v6 }
 0x2a0   : > { %v1110_v17 = vrot.slane %v1102_v11, %v4422_v51  ;;  %v1117_v19 = vrot.slane %v1103_v12, %v4422_v51  ;;  %v1118_v21 = vcombine.low %v1086_v9, %v1101_v10  ;;  %v1119_v22 = vcombine.high %v1086_v9, %v1101_v10 }
 0x2a1   : > { %v1281_v23 = vrot.slane %v1274_v15, %v4418_v47  ;;  %v1289_v24 = vrot.slane %v2954_v16, %v4418_v47  ;;  %v1290_v25 = vcombine.low %v1265_v13, %v1273_v14  ;;  %v854_v13 = vsub.s32 2, %v4389_v27 }
 0x2a2   : > { %v1126_v26 = vrot.slane %v1118_v21, %v4422_v51  ;;  %v1133_v29 = vrot.slane %v1119_v22, %v4422_v51  ;;  %v1138_v32 = vcombine.low %v1110_v17, %v1117_v19  ;;  %v2951_v33 = vcombine.high %v1110_v17, %v1117_v19 }
 0x2a3   : > { %v1298_v34 = vcombine.low %v1281_v23, %v1289_v24  ;;  %v1297_v39 = vrot.slane %v1290_v25, %v4422_v51  ;;  %v855_v14 = vrot.slane %v4395_v30, %v854_v13 }
 0x2a4   : > { %v1145_v35 = vrot.slane %v1138_v32, %v4418_v47  ;;  %v1153_v36 = vrot.slane %v2951_v33, %v4418_v47  ;;  %v1154_v37 = vcombine.low %v1126_v26, %v1133_v29  ;;  %v2952_v38 = vcombine.high %v1126_v26, %v1133_v29 }
 0x2a5   : > { %v1305_v40 = vrot.slane %v1298_v34, %v4422_v51  ;;  %v1063_v15 = vadd.f32 %v1062_v59, %v855_v14  ;;  %v3360_v14 = vld [vmem:[%s4295_s9 + $0x10] sm:$0xff]  }
 0x2a6   : > { %v1161_v41 = vrot.slane %v1154_v37, %v4418_v47  ;;  %v1169_v42 = vrot.slane %v2952_v38, %v4418_v47  ;;  %v1170_v43 = vcombine.low %v1145_v35, %v1153_v36 }
 0x2a7   : > { %v1306_v44 = vcombine.low %v1297_v39, %v1305_v40  ;;  %v1307_v52 = vcombine.high %v1297_v39, %v1305_v40  ;;  %v1312_v23 = vcombine.high %v1063_v15, %v3799_v20  ;;  %v1319_v26 = vrot.slane %v1063_v15, %v4418_v47 }
 0x2a8   : > { %v1178_v45 = vcombine.low %v1161_v41, %v1169_v42  ;;  %v1177_v49 = vrot.slane %v1170_v43, %v4422_v51 }
 0x2a9   : > { %v1430_v46 = vpack.c.bf16 %v1306_v44, %v1306_v44  ;;  %v1431_v54 = vpack.c.bf16 %v1307_v52, %v1307_v52  ;;  %v1326_v33 = vrot.slane %v1312_v23, %v4418_v47 }
 0x2aa   : > { %v1185_v48 = vrot.slane %v1178_v45, %v4422_v51 }
 0x2ab   : > { %v1444_v50 = vsel %vm1439_vm1, %v1430_v46, 0  ;;  %v1490_v56 = vsel %vm1439_vm1, %v1431_v54, 0 }
 0x2ac   : > { %3140 = vmatpush3.bf16.xpose.msra.mxu1 %v1444_v50  ;;  %v1186_v53 = vcombine.low %v1177_v49, %v1185_v48  ;;  %v1187_v57 = vcombine.high %v1177_v49, %v1185_v48 }
 0x2ad   : > { %3145 = vmatprep.subr.bf16.mxu1 %v3799_v20 }
 0x2ae   : > { %v1428_v55 = vpack.c.bf16 %v1186_v53, %v1186_v53  ;;  %v1429_v58 = vpack.c.bf16 %v1187_v57, %v1187_v57 }
 0x2b3   : > { %3142 = vmatmul.mubr.msk.bf16.vlgmr.msra.gmra.mrb[4].mxu1 %vm1439_vm1, %v1428_v55 }
 0x2b4   : > { %3146 = vmatpush3.bf16.xpose.msra.mxu1 %v1490_v56  ;;  %3147 = vmatprep.mubr.msk.bf16.mxu1 %vm3801_vm0, %v3799_v20 }
 0x2b5   : > { %3151 = vmatprep.subr.bf16.mxu1 %v3799_v20 }
 0x2bb   : > { %3148 = vmatmul.mubr.msk.bf16.vlgmr.msra.gmra.mrb[8].mxu1 %vm1439_vm1, %v1429_v58 }
 0x2bc   : > { %3153 = vmatprep.mubr.msk.bf16.mxu1 %vm3801_vm0, %v3799_v20 }
 0x386   : > { %v1480_v0 = vpop.f32.mrb[4].mxu1 }
 0x387   : > { %v1481_v1 = vadd.f32 %v2957_v63, %v1480_v0  ;;  %v3143_v2 = vpop.f32.mrb[5].mxu1 }
 0x388   : > { %v1483_v4 = vpop.f32.mrb[6].mxu1 }
 0x389   : > { %v3144_v5 = vpop.f32.mrb[7].mxu1  ;;  %v1533_v6 = vsel %vm1532_vm2, %v1481_v1, -inf }
 0x38a   : > { %1534 = vmax.xlane.f32.xlu1 %v1533_v6 }
 0x38e   : > { %v1526_v7 = vpop.f32.mrb[8].mxu1 }
 0x38f   : > { %v1527_v8 = vadd.f32 %v2957_v63, %v1526_v7  ;;  %v3149_v9 = vpop.f32.mrb[9].mxu1 }
 0x390   : > { %v1529_v10 = vpop.f32.mrb[10].mxu1 }
 0x391   : > { %v3150_v11 = vpop.f32.mrb[11].mxu1  ;;  %v1536_v12 = vsel %vm1532_vm2, %v1527_v8, -inf }
 0x392   : > { %1537 = vmax.xlane.f32.xlu1 %v1536_v12  ;;  %v3358_v11 = vld [vmem:[%s4295_s9] sm:$0xff]   ;;  %v3359_v12 = vld [vmem:[%s4295_s9 + $0x8] sm:$0xff]  }
 0x393   : > { %3164 = vmatpush3.bf16.msra.mxu0 %v3358_v11  ;;  %v3377_v11 = vld [vmem:[%s4301_s26 + $0x2c] ss:$16 sps:$4 sm:$0xff]  }
 0x394   : > { %3165 = vmatprep.subr.bf16.mxu0 %v3799_v20 }
 0x397   : > { %3166 = vmatpush3.bf16.msra.mxu0 %v3359_v12  ;;  %v3372_v12 = vld [vmem:[%s4301_s26 + $0x20] ss:$16 sps:$4 sm:$0xff]  }
 0x398   : > { %3167 = vmatprep.subr.bf16.mxu0 %v3799_v20 }
 0x39b   : > { %3168 = vmatpush3.bf16.msra.mxu0 %v3360_v14  ;;  %v3375_v14 = vld [vmem:[%s4301_s26 + $0x28] ss:$16 sps:$4 sm:$0xff]  }
 0x39c   : > { %3169 = vmatprep.subr.bf16.mxu0 %v3799_v20 }
 0x3a3   : > { %1309 = vrot.lane.b32.xlu1 %v1063_v15, %s3800_s0  ;;  %v3361_v15 = vld [vmem:[%s4295_s9 + $0x18] sm:$0xff]  }
 0x3a4   : > { %3170 = vmatpush3.bf16.msra.mxu0 %v3361_v15  ;;  %v3380_v15 = vld [vmem:[%s4301_s26 + $0x44] ss:$16 sps:$4 sm:$0xff]  }
 0x3a5   : > { %3171 = vmatprep.subr.bf16.mxu0 %v3799_v20 }
 0x417   : > { %v1535_v16 = vpop.xlane.xlu1 %1534 }
 0x418   : > { %v1539_v17 = vsub.f32 %v1481_v1, %v1535_v16  ;;  %v3362_v16 = vld [vmem:[%s4295_s9 + $0x20] sm:$0xff]  }
 0x419   : > { %3172 = vmatpush3.bf16.msra.mxu0 %v3362_v16  ;;  %v3378_v16 = vld [vmem:[%s4301_s26 + $0x40] ss:$16 sps:$4 sm:$0xff]  }
 0x41a   : > { %v1541_v19 = vmul.f32 1.442695, %v1539_v17  ;;  %v3363_v17 = vld [vmem:[%s4295_s9 + $0x28] sm:$0xff]   ;;  %3173 = vmatprep.subr.bf16.mxu0 %v3799_v20 }
 0x41c   : > { %3446 = vpow2.f32 %v1541_v19  ;;  %v3364_v19 = vld [vmem:[%s4295_s9 + $0x30] sm:$0xff]  }
 0x41d   : > { %3174 = vmatpush3.bf16.msra.mxu0 %v3363_v17  ;;  %v3381_v17 = vld [vmem:[%s4301_s26 + $0x48] ss:$16 sps:$4 sm:$0xff]  }
 0x41e   : > { %3175 = vmatprep.subr.bf16.mxu0 %v3799_v20 }
 0x41f   : > { %v1538_v21 = vpop.xlane.xlu1 %1537 }
 0x420   : > { %v1540_v22 = vsub.f32 %v1527_v8, %v1538_v21 }
 0x421   : > { %3176 = vmatpush3.bf16.msra.mxu0 %v3364_v19 }
 0x422   : > { %v1543_v24 = vmul.f32 1.442695, %v1540_v22  ;;  %3177 = vmatprep.subr.bf16.mxu0 %v3799_v20 }
 0x423   : > { %v1310_v25 = vpop.permute.xlu1 %1309 }
 0x424   : > { %3448 = vpow2.f32 %v1543_v24  ;;  %v1327_v29 = vcombine.high %v1310_v25, %v3799_v20  ;;  %v1334_v30 = vrot.slane %v1310_v25, %v4418_v47 }
 0x426   : > { %v3447_v32 = vpop.eup %3446  ;;  %v1341_v34 = vrot.slane %v1327_v29, %v4418_v47  ;;  %v1342_v35 = vcombine.low %v1319_v26, %v1334_v30  ;;  %v1343_v36 = vcombine.high %v1319_v26, %v1334_v30 }
 0x427   : > { %v1545_v37 = vsel %vm1532_vm2, %v3447_v32, 0.0 }
 0x428   : > { %v1350_v38 = vrot.slane %v1342_v35, %v4422_v51  ;;  %v1357_v39 = vrot.slane %v1343_v36, %v4422_v51  ;;  %v1358_v40 = vcombine.low %v1326_v33, %v1341_v34  ;;  %v1359_v41 = vcombine.high %v1326_v33, %v1341_v34  ;;  %1546 = vadd.xlane.f32.xlu0 %v1545_v37 }
 0x42a   : > { %v1366_v42 = vrot.slane %v1358_v40, %v4422_v51  ;;  %v1373_v43 = vrot.slane %v1359_v41, %v4422_v51  ;;  %v1378_v44 = vcombine.low %v1350_v38, %v1357_v39  ;;  %v2955_v45 = vcombine.high %v1350_v38, %v1357_v39 }
 0x42c   : > { %v1385_v46 = vrot.slane %v1378_v44, %v4418_v47  ;;  %v1393_v48 = vrot.slane %v2955_v45, %v4418_v47  ;;  %v1394_v49 = vcombine.low %v1366_v42, %v1373_v43  ;;  %v2956_v50 = vcombine.high %v1366_v42, %v1373_v43  ;;  %v3365_v44 = vld [vmem:[%s4295_s9 + $0x38] sm:$0xff]   ;;  %s4827_s9 = sld [smem:[#allocation43_spill]] }
 0x42d   : > { %3178 = vmatpush3.bf16.msra.mxu0 %v3365_v44  ;;  %v3413_v44 = vld [vmem:[%s4301_s26 + $0xec] ss:$16 sps:$4 sm:$0xff]  }
 0x42e   : > { %v3449_v52 = vpop.eup %3448  ;;  %v1401_v53 = vrot.slane %v1394_v49, %v4418_v47  ;;  %v1409_v54 = vrot.slane %v2956_v50, %v4418_v47  ;;  %v1410_v55 = vcombine.low %v1385_v46, %v1393_v48 }
 0x42f   : > { %v1548_v56 = vsel %vm1532_vm2, %v3449_v52, 0.0 }
 0x430   : > { %1549 = vadd.xlane.f32.xlu1 %v1548_v56  ;;  %v1418_v57 = vcombine.low %v1401_v53, %v1409_v54  ;;  %v1417_v58 = vrot.slane %v1410_v55, %v4422_v51 }
 0x432   : > { %v1425_v59 = vrot.slane %v1418_v57, %v4422_v51  ;;  %s4828_s11 = scalar_lea.vmem %s4827_s9, %s4311_s29  ;;  %s3804_s29 = smov [#allocation13]  }
 0x434   : > { %v1426_v60 = vcombine.low %v1417_v58, %v1425_v59  ;;  %v1427_v61 = vcombine.high %v1417_v58, %v1425_v59 }
 0x436   : > { %v1557_v62 = vpack.c.bf16 %v1426_v60, %v1426_v60  ;;  %v1558_v63 = vpack.c.bf16 %v1427_v61, %v1427_v61 }
 0x438   : > { %v1564_v0 = vsel %vm1562_vm3, %v1557_v62, 0  ;;  %v1610_v1 = vsel %vm1562_vm3, %v1558_v63, 0 }
 0x439   : > { %3152 = vmatpush3.bf16.msra.mxu1 %v1564_v0 }
 0x43a   : > { %3157 = vmatprep.subr.bf16.mxu1 %v3799_v20 }
 0x4b5   : > { %v1547_v2 = vpop.xlane.xlu0 %1546 }
 0x4b6   : > { %3450 = vrcp.f32 %v1547_v2 }
 0x4bd   : > { %v1550_v4 = vpop.xlane.xlu1 %1549 }
 0x4be   : > { %3452 = vrcp.f32 %v1550_v4 }
 0x4c0   : > { %v3451_v5 = vpop.eup %3450 }
 0x4c1   : > { %v1553_v6 = vmul.f32 %v3451_v5, %v3447_v32 }
 0x4c3   : > { %v1555_v7 = vpack.c.bf16 %v1553_v6, %v1553_v6 }
 0x4c5   : > { %3154 = vmatmul.mubr.msk.bf16.vlgmr.msra.gmra.mrb[12].mxu1 %vm1532_vm2, %v1555_v7  ;;  %v3366_v7 = vld [vmem:[%s4301_s26] ss:$16 sps:$4 sm:$0xff]  }
 0x4c6   : > { %3158 = vmatpush3.bf16.msra.mxu1 %v1610_v1  ;;  %3159 = vmatprep.mubr.msk.bf16.mxu1 %vm3801_vm0, %v3799_v20 }
 0x4c8   : > { %v3453_v8 = vpop.eup %3452 }
 0x4c9   : > { %v1554_v9 = vmul.f32 %v3453_v8, %v3449_v52  ;;  %v3368_v8 = vld [vmem:[%s4301_s26 + $0x4] ss:$16 sps:$4 sm:$0xff]  }
 0x4ca   : > { %2129 = vmatprep.subr.bf16.mxu1 %v3368_v8  ;;  %v3429_v8 = vld [vmem:[%s4303_s24 + $0x98] sm:$0xff]  }
 0x4cb   : > { %v1556_v10 = vpack.c.bf16 %v1554_v9, %v1554_v9  ;;  %v3371_v9 = vld [vmem:[%s4301_s26 + $0xc] ss:$16 sps:$4 sm:$0xff]  }
 0x4cc   : > { %2170 = vmatprep.subr.bf16.mxu0 %v3371_v9  ;;  %v3431_v9 = vld [vmem:[%s4303_s24 + $0xe0] sm:$0xff]  }
 0x4cd   : > { %3160 = vmatmul.mubr.msk.bf16.vlgmr.msra.gmra.mrb[16].mxu1 %vm1532_vm2, %v1556_v10  ;;  %v3374_v10 = vld [vmem:[%s4301_s26 + $0x24] ss:$16 sps:$4 sm:$0xff]  }
 0x4ce   : > { %2161 = vmatprep.mubr.bf16.mxu1 %v3798_v3  ;;  %2130 = vmatpush1.bf16.msra.mxu1 %v3366_v7  ;;  %v3428_v7 = vld [vmem:[%s4303_s24 + $0x18] sm:$0xff]  }
 0x4cf   : > { %2131 = vmatprep.subr.bf16.mxu1 %v3374_v10  ;;  %v3432_v10 = vld [vmem:[%s4303_s24 + $0x20] sm:$0xff]  }
 0x4d2   : > { %2132 = vmatpush1.bf16.msra.mxu1 %v3372_v12  ;;  %v3434_v12 = vld [vmem:[%s4303_s24 + $0x68] sm:$0xff]  }
 0x4d3   : > { %2133 = vmatprep.subr.bf16.mxu1 %v3380_v15  ;;  %v3436_v15 = vld [vmem:[%s4303_s24 + $0x28] sm:$0xff]  }
 0x4d6   : > { %2134 = vmatpush1.bf16.msra.mxu1 %v3378_v16  ;;  %v3438_v16 = vld [vmem:[%s4303_s24 + $0x70] sm:$0xff]  }
 0x598   : > { %v1600_v21 = vpop.f32.mrb[12].mxu1 }
 0x599   : > { %v3155_v22 = vpop.f32.mrb[13].mxu1  ;;  %v1652_v25 = vcombine.high %v1600_v21, %v3799_v20  ;;  %v1659_v29 = vrot.slane %v1600_v21, %v4418_v47 }
 0x59a   : > { %v1603_v23 = vpop.f32.mrb[14].mxu1 }
 0x59b   : > { %v3156_v24 = vpop.f32.mrb[15].mxu1  ;;  %v1666_v35 = vrot.slane %v1652_v25, %v4418_v47  ;;  %v3389_v25 = vld [vmem:[%s4301_s26 + $0x6c] ss:$16 sps:$4 sm:$0xff]  }
 0x59c   : > { %v3386_v24 = vld [vmem:[%s4301_s26 + $0x64] ss:$16 sps:$4 sm:$0xff]  }
 0x59d   : > { %2135 = vmatprep.subr.bf16.mxu1 %v3386_v24  ;;  %v3444_v24 = vld [vmem:[%s4303_s24 + $0x38] sm:$0xff]  }
 0x5a0   : > { %v1646_v26 = vpop.f32.mrb[16].mxu1 }
 0x5a1   : > { %v1667_v30 = vcombine.high %v1646_v26, %v3799_v20  ;;  %v1674_v32 = vrot.slane %v1646_v26, %v4418_v47  ;;  %v3161_v33 = vpop.f32.mrb[17].mxu1  ;;  %v3384_v26 = vld [vmem:[%s4301_s26 + $0x60] ss:$16 sps:$4 sm:$0xff]  }
 0x5a2   : > { %v1649_v34 = vpop.f32.mrb[18].mxu1  ;;  %2136 = vmatpush1.bf16.msra.mxu1 %v3384_v26  ;;  %v3390_v33 = vld [vmem:[%s4301_s26 + $0x80] ss:$16 sps:$4 sm:$0xff]  }
 0x5a3   : > { %v1681_v36 = vrot.slane %v1667_v30, %v4418_v47  ;;  %v1682_v37 = vcombine.low %v1659_v29, %v1674_v32  ;;  %v1683_v38 = vcombine.high %v1659_v29, %v1674_v32  ;;  %v3162_v39 = vpop.f32.mrb[19].mxu1  ;;  %v3387_v29 = vld [vmem:[%s4301_s26 + $0x68] ss:$16 sps:$4 sm:$0xff]   ;;  %v3392_v30 = vld [vmem:[%s4301_s26 + $0x84] ss:$16 sps:$4 sm:$0xff]  }
 0x5a4   : > { %v3395_v32 = vld [vmem:[%s4301_s26 + $0x8c] ss:$16 sps:$4 sm:$0xff]   ;;  %v3393_v34 = vld [vmem:[%s4301_s26 + $0x88] ss:$16 sps:$4 sm:$0xff]   ;;  %2137 = vmatprep.subr.bf16.mxu1 %v3392_v30  ;;  %v3404_v39 = vld [vmem:[%s4301_s26 + $0xc4] ss:$16 sps:$4 sm:$0xff]  }
 0x5a5   : > { %v1690_v40 = vrot.slane %v1682_v37, %v4422_v51  ;;  %v1697_v41 = vrot.slane %v1683_v38, %v4422_v51  ;;  %v1698_v42 = vcombine.low %v1666_v35, %v1681_v36  ;;  %v1699_v43 = vcombine.high %v1666_v35, %v1681_v36  ;;  %v3398_v35 = vld [vmem:[%s4301_s26 + $0xa4] ss:$16 sps:$4 sm:$0xff]   ;;  %v3401_v36 = vld [vmem:[%s4301_s26 + $0xac] ss:$16 sps:$4 sm:$0xff]   ;;  %v3396_v37 = vld [vmem:[%s4301_s26 + $0xa0] ss:$16 sps:$4 sm:$0xff]  }
 0x5a6   : > { %2138 = vmatpush1.bf16.msra.mxu1 %v3390_v33  ;;  %v3399_v38 = vld [vmem:[%s4301_s26 + $0xa8] ss:$16 sps:$4 sm:$0xff]   ;;  %v1947_v26 = vld [vmem:[%s4335_s21] sm:$0xf] }
 0x5a7   : > { %v1706_v20 = vrot.slane %v1698_v42, %v4422_v51  ;;  %v1713_v45 = vrot.slane %v1699_v43, %v4422_v51  ;;  %v1718_v46 = vcombine.low %v1690_v40, %v1697_v41  ;;  %v2962_v48 = vcombine.high %v1690_v40, %v1697_v41  ;;  %2139 = vmatprep.subr.bf16.mxu1 %v3398_v35  ;;  %v3407_v40 = vld [vmem:[%s4301_s26 + $0xcc] ss:$16 sps:$4 sm:$0xff]   ;;  %v3402_v41 = vld [vmem:[%s4301_s26 + $0xc0] ss:$16 sps:$4 sm:$0xff]   ;;  %v3405_v42 = vld [vmem:[%s4301_s26 + $0xc8] ss:$16 sps:$4 sm:$0xff]  }
 0x5a8   : > { %v3410_v43 = vld [vmem:[%s4301_s26 + $0xe4] ss:$16 sps:$4 sm:$0xff]   ;;  %v1952_v30 = vrot.slane %v1947_v26, %v846_v31  ;;  %v1956_v33 = vrot.slane %v1947_v26, %v850_v28 }
 0x5a9   : > { %v1725_v49 = vrot.slane %v1718_v46, %v4418_v47  ;;  %v1733_v50 = vrot.slane %v2962_v48, %v4418_v47  ;;  %v1734_v52 = vcombine.low %v1706_v20, %v1713_v45  ;;  %v2963_v53 = vcombine.high %v1706_v20, %v1713_v45  ;;  %v3408_v20 = vld [vmem:[%s4301_s26 + $0xe0] ss:$16 sps:$4 sm:$0xff]   ;;  %v3411_v45 = vld [vmem:[%s4301_s26 + $0xe8] ss:$16 sps:$4 sm:$0xff]  }
 0x5aa   : > { %2140 = vmatpush1.bf16.msra.mxu1 %v3396_v37 }
 0x5ab   : > { %v1741_v54 = vrot.slane %v1734_v52, %v4418_v47  ;;  %v1749_v55 = vrot.slane %v2963_v53, %v4418_v47  ;;  %v1750_v56 = vcombine.low %v1725_v49, %v1733_v50  ;;  %v2964_v47 = vld [vmem:[%s781_s27] ss:$0 sm:$0xff]  ;;  %2141 = vmatprep.subr.bf16.mxu1 %v3404_v39 }
 0x5ac   : > { %v2973_v52 = vld [vmem:[%s4828_s11] ss:$0 sm:$0xff] }
 0x5ad   : > { %v1758_v57 = vcombine.low %v1741_v54, %v1749_v55  ;;  %v1757_v58 = vrot.slane %v1750_v56, %v4422_v51  ;;  %v2974_v54 = vld [vmem:[%s4830_s12] ss:$0 sm:$0xff] }
 0x5ae   : > { %2142 = vmatpush1.bf16.msra.mxu1 %v3402_v41 }
 0x5af   : > { %v1765_v59 = vrot.slane %v1758_v57, %v4422_v51  ;;  %2143 = vmatprep.subr.bf16.mxu1 %v3410_v43 }
 0x5b1   : > { %v1767_v60 = vcombine.high %v1757_v58, %v1765_v59  ;;  %v1766_v61 = vcombine.low %v1757_v58, %v1765_v59  ;;  %v3414_v58 = vld [vmem:[%s4303_s24 + $0x40] sm:$0xff]  }
 0x5b2   : > { %2144 = vmatpush1.bf16.msra.mxu1 %v3408_v20  ;;  %v3415_v59 = vld [vmem:[%s4303_s24 + $0xc0] sm:$0xff]  }
 0x5b3   : > { %1769 = vrot.lane.b32.xlu0 %v1767_v60, %s3800_s0  ;;  %v3416_v60 = vld [vmem:[%s4303_s24] sm:$0xff]   ;;  %3075 = vmatprep.subr.bf16.mxu1 %v3414_v58  ;;  %s2637_s0 = sshll.u32 %s4351_s30, 4  ;;  %s4647_s0 = int_to_ptr.vmem [resolvable:$true] %s2637_s0 }
 0x5b4   : > { %s3646_s19 = scalar_lea.vmem %s4647_s0, 128 }
 0x5b5   : > { %p3647_p12 = scmp.ne.s32.totalorder %s4647_s0, %s3646_s19 }
 0x5b7   : > { %p3648_p11 = pnand %p3647_p12, %p4837_p1 }
 0x5b9   : > { %p3649_p2 = pneg %p3648_p11 }
 0x625   : > { %v1770_v62 = vpop.permute.xlu0 %1769 }
 0x626   : > { %v1772_v63 = vsel %vm1439_vm1, %v1766_v61, %v1770_v62  ;;  %v3417_v61 = vld [vmem:[%s4303_s24 + $0x80] sm:$0xff]   ;;  %v3418_v62 = vld [vmem:[%s4303_s24 + $0x48] sm:$0xff]  }
 0x627   : > { %v1773_v0 = vpack.c.bf16 %v1772_v63, %v1772_v63  ;;  %v3419_v63 = vld [vmem:[%s4303_s24 + $0xc8] sm:$0xff]  }
 0x629   : > { %3180 = vmatmul.mubr.bf16.vlgmr.msra.gmra.mrb[4].mxu0 %v1773_v0  ;;  %v3420_v0 = vld [vmem:[%s4303_s24 + $0x8] sm:$0xff]  }
 0x62a   : > { %2202 = vmatprep.mubr.bf16.mxu0 %v3798_v3  ;;  %v3369_v3 = vld [vmem:[%s4301_s26 + $0x8] ss:$16 sps:$4 sm:$0xff]  }
 0x62b   : > { %2171 = vmatpush1.bf16.msra.mxu0 %v3369_v3  ;;  %v3430_v3 = vld [vmem:[%s4303_s24 + $0x60] sm:$0xff]  }
 0x62c   : > { %2172 = vmatprep.subr.bf16.mxu0 %v3377_v11  ;;  %v3433_v11 = vld [vmem:[%s4303_s24 + $0xa0] sm:$0xff]  }
 0x62f   : > { %2173 = vmatpush1.bf16.msra.mxu0 %v3375_v14  ;;  %v3435_v14 = vld [vmem:[%s4303_s24 + $0xe8] sm:$0xff]  }
 0x6fc   : > { %v1879_v51 = vpop.f32.mrb[4].mxu0 }
 0x6fd   : > { %v1880_v1 = vadd.f32 %v2964_v47, %v1879_v51  ;;  %v3181_v2 = vpop.f32.mrb[5].mxu0  ;;  %v3421_v47 = vld [vmem:[%s4303_s24 + $0x88] sm:$0xff]   ;;  %v3422_v51 = vld [vmem:[%s4303_s24 + $0x50] sm:$0xff]  }
 0x6fe   : > { %v1882_v4 = vpop.f32.mrb[6].mxu0  ;;  %v3424_v2 = vld [vmem:[%s4303_s24 + $0x10] sm:$0xff]  }
 0x6ff   : > { %v3182_v5 = vpop.f32.mrb[7].mxu0  ;;  %v1885_v6 = vadd.f32 %v1880_v1, %v4374_v18  ;;  %v3383_v18 = vld [vmem:[%s4301_s26 + $0x4c] ss:$16 sps:$4 sm:$0xff]   ;;  %v3423_v1 = vld [vmem:[%s4303_s24 + $0xd0] sm:$0xff]  }
 0x700   : > { %2174 = vmatprep.subr.bf16.mxu0 %v3383_v18  ;;  %v3425_v4 = vld [vmem:[%s4303_s24 + $0x90] sm:$0xff]   ;;  %v3426_v5 = vld [vmem:[%s4303_s24 + $0x58] sm:$0xff]   ;;  %v3437_v18 = vld [vmem:[%s4303_s24 + $0xa8] sm:$0xff]  }
 0x701   : > { %1888 = vadd.xlane.f32.xlu0 %v1885_v6  ;;  %2175 = vmatpush1.bf16.msra.mxu0 %v3381_v17  ;;  %v3439_v17 = vld [vmem:[%s4303_s24 + $0xf0] sm:$0xff]  }
 0x702   : > { %2176 = vmatprep.subr.bf16.mxu0 %v3389_v25  ;;  %v3445_v25 = vld [vmem:[%s4303_s24 + $0xb8] sm:$0xff]  }
 0x705   : > { %2177 = vmatpush1.bf16.msra.mxu0 %v3387_v29  ;;  %v1963_v29 = vsub.s32 3, %v4389_v27 }
 0x706   : > { %2178 = vmatprep.subr.bf16.mxu0 %v3395_v32  ;;  %v1960_v32 = vrot.slane %v1947_v26, %v854_v13 }
 0x709   : > { %2179 = vmatpush1.bf16.msra.mxu0 %v3393_v34  ;;  %v1964_v34 = vrot.slane %v1947_v26, %v1963_v29 }
 0x70a   : > { %2180 = vmatprep.subr.bf16.mxu0 %v3401_v36 }
 0x70d   : > { %2181 = vmatpush1.bf16.msra.mxu0 %v3399_v38 }
 0x70e   : > { %2182 = vmatprep.subr.bf16.mxu0 %v3407_v40 }
 0x711   : > { %2183 = vmatpush1.bf16.msra.mxu0 %v3405_v42 }
 0x712   : > { %2184 = vmatprep.subr.bf16.mxu0 %v3413_v44 }
 0x715   : > { %2185 = vmatpush1.bf16.msra.mxu0 %v3411_v45 }
 0x716   : > { %3097 = vmatprep.subr.bf16.mxu0 %v3415_v59 }
 0x78e   : > { %v1889_v19 = vpop.xlane.xlu0 %1888 }
 0x78f   : > { %v1891_v21 = vmul.f32 0.0078125, %v1889_v19  ;;  %v3440_v19 = vld [vmem:[%s4303_s24 + $0x30] sm:$0xff]  }
 0x791   : > { %v1892_v22 = vsub.f32 %v1885_v6, %v1891_v21  ;;  %v3427_v6 = vld [vmem:[%s4303_s24 + $0xd8] sm:$0xff]   ;;  %v3441_v21 = vld [vmem:[%s4303_s24 + $0xb0] sm:$0xff]  }
 0x793   : > { %v1893_v23 = vmul.f32 %v1892_v22, %v1892_v22 }
 0x795   : > { %1894 = vadd.xlane.f32.xlu1 %v1893_v23  ;;  %v3443_v23 = vld [vmem:[%s4303_s24 + $0xf8] sm:$0xff]  }
 0x822   : > { %v1895_v46 = vpop.xlane.xlu1 %1894 }
 0x823   : > { %v1896_v48 = vmul.f32 0.0078125, %v1895_v46 }
 0x825   : > { %v1897_v49 = vadd.f32 1e-12, %v1896_v48 }
 0x827   : > { %3454 = vrsqrt.f32 %v1897_v49 }
 0x831   : > { %v3455_v50 = vpop.eup %3454 }
 0x832   : > { %v1899_v53 = vmul.f32 %v3455_v50, %v1892_v22  ;;  %v3442_v22 = vld [vmem:[%s4303_s24 + $0x78] sm:$0xff]  }
 0x834   : > { %v1906_v55 = vmul.f32 %v2973_v52, %v1899_v53 }
 0x836   : > { %v4580_v56 = vadd.f32 %v2974_v54, %v1906_v55 }
 0x838   : > { %v1914_v57 = vpack.c.bf16 %v4580_v56, %v4580_v56 }
 0x83a   : > { %2162 = vmatmul.mubr.bf16.vlgmr.msra.gmra.mrb[20].mxu1 %v1914_v57  ;;  %2203 = vmatmul.mubr.bf16.vlgmr.msra.gmra.mrb[8].mxu0 %v1914_v57 }
 0x83b   : > { %3076 = vmatpush3.bf16.msra.mxu1 %v3416_v60  ;;  %3098 = vmatpush3.bf16.msra.mxu0 %v3417_v61 }
 0x83c   : > { %3077 = vmatprep.subr.bf16.mxu1 %v3418_v62  ;;  %3099 = vmatprep.subr.bf16.mxu0 %v3419_v63 }
 0x83f   : > { %3078 = vmatpush3.bf16.msra.mxu1 %v3420_v0  ;;  %3100 = vmatpush3.bf16.msra.mxu0 %v3421_v47 }
 0x840   : > { %3079 = vmatprep.subr.bf16.mxu1 %v3422_v51  ;;  %3101 = vmatprep.subr.bf16.mxu0 %v3423_v1 }
 0x843   : > { %3080 = vmatpush3.bf16.msra.mxu1 %v3424_v2  ;;  %3102 = vmatpush3.bf16.msra.mxu0 %v3425_v4 }
 0x844   : > { %3081 = vmatprep.subr.bf16.mxu1 %v3426_v5  ;;  %3103 = vmatprep.subr.bf16.mxu0 %v3427_v6 }
 0x847   : > { %3082 = vmatpush3.bf16.msra.mxu1 %v3428_v7  ;;  %3104 = vmatpush3.bf16.msra.mxu0 %v3429_v8 }
 0x848   : > { %3083 = vmatprep.subr.bf16.mxu1 %v3430_v3  ;;  %3105 = vmatprep.subr.bf16.mxu0 %v3431_v9 }
 0x84b   : > { %3084 = vmatpush3.bf16.msra.mxu1 %v3432_v10  ;;  %3106 = vmatpush3.bf16.msra.mxu0 %v3433_v11 }
 0x84c   : > { %3085 = vmatprep.subr.bf16.mxu1 %v3434_v12  ;;  %3107 = vmatprep.subr.bf16.mxu0 %v3435_v14 }
 0x84f   : > { %3086 = vmatpush3.bf16.msra.mxu1 %v3436_v15  ;;  %3108 = vmatpush3.bf16.msra.mxu0 %v3437_v18 }
 0x850   : > { %3087 = vmatprep.subr.bf16.mxu1 %v3438_v16  ;;  %3109 = vmatprep.subr.bf16.mxu0 %v3439_v17 }
 0x853   : > { %3088 = vmatpush3.bf16.msra.mxu1 %v3440_v19  ;;  %3110 = vmatpush3.bf16.msra.mxu0 %v3441_v21 }
 0x854   : > { %3089 = vmatprep.subr.bf16.mxu1 %v3442_v22  ;;  %3111 = vmatprep.subr.bf16.mxu0 %v3443_v23  ;;  %v3007_v23 = vld [vmem:[%s794_s6] ss:$0 sm:$0xff] }
 0x857   : > { %3090 = vmatpush3.bf16.msra.mxu1 %v3444_v24  ;;  %3112 = vmatpush3.bf16.msra.mxu0 %v3445_v25 }
 0x90d   : > { %v2163_v35 = vpop.f32.mrb[20].mxu1  ;;  %v2204_v36 = vpop.f32.mrb[8].mxu0 }
 0x90e   : > { %v2164_v37 = vadd.f32 %v2163_v35, %v1952_v30  ;;  %v2205_v38 = vadd.f32 %v2204_v36, %v1960_v32  ;;  %v2165_v39 = vpop.f32.mrb[21].mxu1  ;;  %v2206_v40 = vpop.f32.mrb[9].mxu0 }
 0x90f   : > { %v2166_v41 = vadd.f32 %v2165_v39, %v1956_v33  ;;  %v2207_v42 = vadd.f32 %v2206_v40, %v1964_v34  ;;  %v2167_v43 = vpop.f32.mrb[22].mxu1  ;;  %v2208_v44 = vpop.f32.mrb[10].mxu0 }
 0x910   : > { %v2211_v20 = vmul.f32 %v2164_v37, %v2164_v37  ;;  %v2213_v45 = vmul.f32 %v2205_v38, %v2205_v38  ;;  %v2168_v31 = vpop.f32.mrb[23].mxu1  ;;  %v2209_v46 = vpop.f32.mrb[11].mxu0 }
 0x911   : > { %v2212_v48 = vmul.f32 %v2166_v41, %v2166_v41  ;;  %v2214_v13 = vmul.f32 %v2207_v42, %v2207_v42  ;;  %v3041_v31 = vld [vmem:[%s800_s28] ss:$0 sm:$0xff]  ;;  %s3650_s28 = sshll.u32 %s3804_s29, 4  ;;  %s3651_s28 = int_to_ptr.vmem [resolvable:$false] %s3650_s28 }
 0x912   : > { %v2215_v49 = vmul.f32 %v2211_v20, %v2164_v37  ;;  %v2217_v27 = vmul.f32 %v2213_v45, %v2205_v38  ;;  %s3652_s13 = scalar_lea.vmem %s3651_s28, 256  ;;  %p3653_p9 = scmp.lt.s32.totalorder %s4647_s0, %s3651_s28 }
 0x913   : > { %v2216_v28 = vmul.f32 %v2212_v48, %v2166_v41  ;;  %v2218_v50 = vmul.f32 %v2214_v13, %v2207_v42  ;;  %p3654_p0 = scmp.lt.s32.totalorder %s3652_s13, %s3646_s19 }
 0x914   : > { %v2219_v52 = vmul.f32 0.044715, %v2215_v49  ;;  %v2221_v53 = vmul.f32 0.044715, %v2217_v27 }
 0x915   : > { %v2220_v54 = vmul.f32 0.044715, %v2216_v28  ;;  %v2222_v55 = vmul.f32 0.044715, %v2218_v50  ;;  %p3655_p6 = por %p3654_p0, %p3653_p9 }
 0x916   : > { %v2223_v57 = vadd.f32 %v2219_v52, %v2164_v37  ;;  %v2225_v58 = vadd.f32 %v2221_v53, %v2205_v38 }
 0x917   : > { %v2224_v59 = vadd.f32 %v2220_v54, %v2166_v41  ;;  %v2226_v60 = vadd.f32 %v2222_v55, %v2207_v42  ;;  %p3656_p7 = pnand %p3655_p6, %p3649_p2 }
 0x918   : > { %v2227_v61 = vmul.f32 0.7978846, %v2223_v57  ;;  %v2229_v62 = vmul.f32 0.7978846, %v2225_v58 }
 0x919   : > { %v2228_v63 = vmul.f32 0.7978846, %v2224_v59  ;;  %v2230_v0 = vmul.f32 0.7978846, %v2226_v60 }
 0x91a   : > { %3456 = vtanh.f32 %v2227_v61 }
 0x91b   : > { %3458 = vtanh.f32 %v2229_v62 }
 0x91c   : > { %3460 = vtanh.f32 %v2228_v63 }
 0x91d   : > { %3462 = vtanh.f32 %v2230_v0 }
 0x924   : > { %v3457_v47 = vpop.eup %3456 }
 0x925   : > { %v3459_v51 = vpop.eup %3458  ;;  %v2235_v1 = vadd.f32 1.0, %v3457_v47 }
 0x926   : > { %v3461_v2 = vpop.eup %3460  ;;  %v2237_v4 = vadd.f32 1.0, %v3459_v51 }
 0x927   : > { %v3463_v5 = vpop.eup %3462  ;;  %v2236_v6 = vadd.f32 1.0, %v3461_v2  ;;  %v2239_v7 = vmul.f32 0.5, %v2235_v1 }
 0x928   : > { %v2238_v8 = vadd.f32 1.0, %v3463_v5  ;;  %v2241_v3 = vmul.f32 0.5, %v2237_v4 }
 0x929   : > { %v2240_v9 = vmul.f32 0.5, %v2236_v6  ;;  %v2243_v11 = vmul.f32 %v2239_v7, %v2164_v37 }
 0x92a   : > { %v2242_v10 = vmul.f32 0.5, %v2238_v8  ;;  %v2245_v14 = vmul.f32 %v2241_v3, %v2205_v38 }
 0x92b   : > { %v2244_v12 = vmul.f32 %v2240_v9, %v2166_v41  ;;  %v2247_v17 = vpack.c.bf16 %v2243_v11, %v2243_v11 }
 0x92c   : > { %v2246_v15 = vmul.f32 %v2242_v10, %v2207_v42  ;;  %v2249_v19 = vpack.c.bf16 %v2245_v14, %v2245_v14 }
 0x92d   : > { %v2248_v18 = vpack.c.bf16 %v2244_v12, %v2244_v12 }
 0x92e   : > { %v2250_v16 = vpack.c.bf16 %v2246_v15, %v2246_v15 }
 0x92f   : > { %2546 = vmatprep.mubr.bf16.mxu1 %v2248_v18 }
 0x930   : > { %2586 = vmatprep.mubr.bf16.mxu0 %v2250_v16  ;;  %2547 = vmatmul.mubr.bf16.vlgmr.msra.gmra.mrb[24].mxu1 %v2247_v17 }
 0x931   : > { %2587 = vmatmul.mubr.bf16.vlgmr.msra.gmra.mrb[12].mxu0 %v2249_v19 }
 0xa03   : > { %v3091_v21 = vpop.f32.mrb[24].mxu1 }
 0xa04   : > { %v3113_v22 = vpop.f32.mrb[12].mxu0  ;;  %v3092_v24 = vpop.f32.mrb[25].mxu1 }
 0xa05   : > { %v3093_v25 = vadd.f32 %v3092_v24, %v3091_v21  ;;  %v3114_v26 = vpop.f32.mrb[13].mxu0  ;;  %v3094_v29 = vpop.f32.mrb[26].mxu1 }
 0xa06   : > { %v3115_v30 = vadd.f32 %v3114_v26, %v3113_v22  ;;  %v3116_v32 = vpop.f32.mrb[14].mxu0  ;;  %v3095_v33 = vpop.f32.mrb[27].mxu1 }
 0xa07   : > { %v2549_v34 = vadd.f32 %v3093_v25, %v3007_v23  ;;  %v3117_v35 = vpop.f32.mrb[15].mxu0 }
 0xa09   : > { %v2589_v36 = vadd.f32 %v3115_v30, %v2549_v34 }
 0xa0b   : > { %v2594_v37 = vadd.f32 %v2589_v36, %v4580_v56  ;;  %v3040_v56 = vld [vmem:[%s797_s20] ss:$0 sm:$0xff]  ;;  %s2624_s20 = scalar_lea.sflag [#allocation4], %s4270_s5 }
 0xa0d   : > { %2597 = vadd.xlane.f32.xlu1 %v2594_v37 }
 0xa9a   : > { %v2598_v38 = vpop.xlane.xlu1 %2597 }
 0xa9b   : > { %v2599_v39 = vmul.f32 0.0078125, %v2598_v38 }
 0xa9d   : > { %v2600_v40 = vsub.f32 %v2594_v37, %v2599_v39 }
 0xa9f   : > { %v2601_v41 = vmul.f32 %v2600_v40, %v2600_v40 }
 0xaa1   : > { %2602 = vadd.xlane.f32.xlu1 %v2601_v41 }
 0xb2e   : > { %v2603_v42 = vpop.xlane.xlu1 %2602 }
 0xb2f   : > { %v2604_v43 = vmul.f32 0.0078125, %v2603_v42 }
 0xb31   : > { %v2605_v44 = vadd.f32 1e-12, %v2604_v43 }
 0xb33   : > { %3464 = vrsqrt.f32 %v2605_v44 }
 0xb3d   : > { %v3465_v20 = vpop.eup %3464 }
 0xb3e   : > { %v2607_v45 = vmul.f32 %v3465_v20, %v2600_v40 }
 0xb40   : > { %v2614_v46 = vmul.f32 %v3040_v56, %v2607_v45 }
 0xb42   : > { %v2621_v48 = vadd.f32 %v3041_v31, %v2614_v46 }
 0xb44   : > { %2622 = vst [vmem:[%s4351_s30] sm:$0xff] %v2621_v48 }
 0xb45   : > { %3659 = shalt.err (!%p3656_p7)
}
 0xb46   : > { %s3660_s5 = scalar_lea.hbm %s4645_s22, 128  ;;  %s3664_s11 = scalar_lea.hbm %s4836_s10, 256 }
 0xb47   : > { %p3661_p13 = scmp.ne.s32.totalorder %s4645_s22, %s3660_s5  ;;  %p3665_p3 = scmp.lt.u32.totalorder %s4645_s22, %s4836_s10 }
 0xb48   : > { %p3666_p10 = scmp.lt.u32.totalorder %s3664_s11, %s3660_s5  ;;  %p3668_p12 = scmp.lt.u32.totalorder %s3660_s5, %s4645_s22 }
 0xb49   : > { %p3662_p8 = pnand %p3661_p13, %p4837_p1 }
 0xb4a   : > { %p3667_p5 = por %p3666_p10, %p3665_p3 }
 0xb4b   : > { %p3663_p4 = pneg %p3662_p8 }
 0xb4c   : > { %p3669_p11 = por %p3668_p12, %p3667_p5 }
 0xb4e   : > { %p3670_p2 = pnand %p3669_p11, %p3663_p4 }
 0xb50   : > { %3673 = shalt.err (!%p3670_p2)
}
 0xb51   : > { %3199 = dma.vmem_to_hbm [thread:$0]  (%p4837_p1), %s4647_s0, 128, %s4645_s22, %s2624_s20  }
 0xb52 PF: > { %s4838_s16 = sld [smem:[#allocation28_spill]]  ;;  %s4839_s12 = sld [smem:[#allocation22_spill]] }
 0xb53   : > { %s4840_s21 = sld [smem:[#allocation36_spill]] }
 0xb58   : > { %p3225_p9 = scmp.ge.s32.totalorder %s4838_s16, 2  ;;  %s2649_s24 = sand.u32 1, %s4839_s12  }
 0xb59   : > { %p4841_p0 = scmp.ne.s32.totalorder %s4840_s21, 0  ;;  %s2650_s4 = scalar_lea.sflag [#allocation4], %s2649_s24 }
 0xb5b   : > { %p3221_p6 = pnand %p3225_p9, %p4841_p0 }
 0xb5d   : > { %3739 = dma.done.wait (!%p3221_p6), %s2650_s4, 128  }
 0xb5e   : > { %3741 = vsyncadd (!%p3221_p6), %s2650_s4, 4294967168  ;;  %s39_s23 = sadd.s32 1, %s4838_s16   ;;  %s4842_s29 = sld [smem:[#allocation20_spill]] }
 0xb5f   : > { %p36_p7 = scmp.ge.s32.totalorder %s39_s23, 6   ;;  %s4843_s30 = sld [smem:[#allocation21_spill]] }
 0xb60   : > { %s4844_s15 = sld [smem:[#allocation32_spill]]  ;;  %s4845_s18 = sld [smem:[#allocation23_spill]] }
 0xb61   : > { %s4846_s25 = sld [smem:[#allocation33_spill]]  ;;  %s4847_s19 = sld [smem:[#allocation26_spill]] }
 0xb62   : > { %s4848_s20 = sld [smem:[#allocation27_spill]]  ;;  %s4849_s21 = sld [smem:[#allocation30_spill]] }
 0xb63   : > { %s4850_s22 = sld [smem:[#allocation31_spill]]  ;;  %s4851_s16 = smov %s3760_s17 }
 0xb64   :  { %38 = sbr.rel (!%p36_p7) target bundleno = 31 (0x1f), region = 210 }
 0xb66   : > { %s4852_s17 = smov %s4845_s18 }
 0xb67   : > { %s4853_s18 = smov %s4846_s25 }
 0xb6b   :  { %2655 = vsyncpa [#allocation3], 1 }
 0xb6c   :  { %2657 = vsyncpa [#allocation3 + $0x1], 1 }
 0xb6d   :  { %2658 = vsyncpa [#allocation6], 1 }
 0xb6e   :  { %2660 = vsyncpa [#allocation6 + $0x1], 1 }
 0xb6f   :  { %2661 = vsyncpa [#allocation9], 1 }
 0xb70   :  { %2663 = vsyncpa [#allocation9 + $0x1], 1 }
 0xb71   :  { %2664 = vsyncpa [#allocation12], 1 }
 0xb72   :  { %2666 = vsyncpa [#allocation12 + $0x1], 1 }
 0xb73   :  { %2667 = vsyncpa [#allocation4], 1 }
 0xb74   :  { %2669 = vsyncpa [#allocation4 + $0x1], 1 }

</bundles_post_ra>
